<compile_context>
chip_gen: v7x
topology: tpu7x:2x2x1
jax: 0.10.0
libtpu: 0.0.40
codegen_flags: <defaults>
</compile_context>

<pallas_src>
import functools

import jax
import jax.numpy as jnp
from jax import lax
from jax.experimental import pallas as pl
from jax.experimental.pallas import tpu as pltpu


# Above the 16 MiB (v5e) / 32 MiB (v6e, v7x) scoped-VMEM defaults, below
# v7x's 64 MiB physical per-TensorCore budget.
_VMEM_LIMIT = 48 * 1024 * 1024


def _pick_tile(extent, candidates):
    """Largest candidate that divides `extent`; fall back to the full extent."""
    for c in candidates:
        if c <= extent and extent % c == 0:
            return c
    return extent


# ----------------------------------------------------------------------------
# Head-split projection:  (M, C) x per-group (C, hd) weights -> (G, M, hd) bf16
# Used for q (G = heads, weights pre-scaled) and for k,v (G = 2*heads).
# ----------------------------------------------------------------------------
def _head_linear_kernel(x_ref, w_ref, b_ref, o_ref):
    acc = jnp.dot(x_ref[...].astype(jnp.bfloat16), w_ref[...],
                  preferred_element_type=jnp.float32)
    o_ref[...] = (acc + b_ref[...]).astype(o_ref.dtype)


def pallas_head_linear(x, w_heads, b_heads, *, tile_m=512):
    M, C = x.shape
    G, Cw, hd = w_heads.shape
    assert C == Cw
    tm = _pick_tile(M, (tile_m, 256, 128, 64, 32, 16, 8))
    flops = 2 * M * C * G * hd
    bytes_accessed = (M * C * x.dtype.itemsize + w_heads.size * 2
                      + b_heads.size * 4 + G * M * hd * 2)
    return pl.pallas_call(
        _head_linear_kernel,
        out_shape=jax.ShapeDtypeStruct((G, M, hd), jnp.bfloat16),
        grid=(M // tm, G),
        in_specs=[
            # x tile stays resident across the inner group axis (same block idx)
            pl.BlockSpec((tm, C), lambda i, g: (i, 0)),
            pl.BlockSpec((None, C, hd), lambda i, g: (g, 0, 0)),
            pl.BlockSpec((None, 1, hd), lambda i, g: (g, 0, 0)),
        ],
        out_specs=pl.BlockSpec((None, tm, hd), lambda i, g: (g, i, 0)),
        compiler_params=pltpu.CompilerParams(
            dimension_semantics=("parallel", "parallel"),
            vmem_limit_bytes=_VMEM_LIMIT),
        cost_estimate=pl.CostEstimate(flops=flops, transcendentals=0,
                                      bytes_accessed=bytes_accessed),
    )(x, w_heads.astype(jnp.bfloat16), b_heads.astype(jnp.float32))


# ----------------------------------------------------------------------------
# Attention core: grid = (B, heads, N/tq); head-major bf16 inputs, bf16 output.
# ----------------------------------------------------------------------------
def _attn_kernel(q_ref, k_ref, v_ref, bias_ref, o_ref):
    # q: (tq, hd), k/v: (N, hd), bias: (tq, N)   -- all bf16
    s = lax.dot_general(q_ref[...], k_ref[...], (((1,), (1,)), ((), ())),
                        preferred_element_type=jnp.float32)       # (tq, N) fp32
    s = s + bias_ref[...].astype(jnp.float32)
    s = s - jnp.max(s, axis=-1, keepdims=True)
    p = jnp.exp(s)
    p = p * pl.reciprocal(jnp.sum(p, axis=-1, keepdims=True), approx=True)
    o_ref[...] = jnp.dot(p.astype(jnp.bfloat16), v_ref[...],
                         preferred_element_type=jnp.float32).astype(o_ref.dtype)


def pallas_cross_attention(q, kv, rel_bias, num_heads):
    """q: (heads, B, N, hd) bf16; kv: (2*heads, B, N, hd) bf16 with k-heads
    then v-heads on the leading axis; rel_bias: (heads, N, N) bf16.
    Returns (heads, B, N, hd) bf16."""
    H, B, N, hd = q.shape
    assert H == num_heads
    tq = _pick_tile(N, (512, 256, 128))
    # TODO(synk): for very large N, also flash-tile the KV/bias axis with an
    # online-softmax (m, l, acc) accumulator instead of a full (N, hd) K/V block.
    flops = 4 * B * H * N * N * hd
    bytes_accessed = (q.size + kv.size) * 2 + rel_bias.size * 2 + H * B * N * hd * 2
    return pl.pallas_call(
        _attn_kernel,
        out_shape=jax.ShapeDtypeStruct((H, B, N, hd), jnp.bfloat16),
        grid=(B, H, N // tq),
        in_specs=[
            pl.BlockSpec((None, None, tq, hd), lambda b, h, qi: (h, b, qi, 0)),
            pl.BlockSpec((None, None, N, hd), lambda b, h, qi: (h, b, 0, 0)),
            pl.BlockSpec((None, None, N, hd),
                         lambda b, h, qi: (h + num_heads, b, 0, 0)),
            pl.BlockSpec((None, tq, N), lambda b, h, qi: (h, qi, 0)),
        ],
        out_specs=pl.BlockSpec((None, None, tq, hd),
                               lambda b, h, qi: (h, b, qi, 0)),
        compiler_params=pltpu.CompilerParams(
            dimension_semantics=("parallel", "parallel", "parallel"),
            vmem_limit_bytes=_VMEM_LIMIT),
        cost_estimate=pl.CostEstimate(flops=flops,
                                      transcendentals=B * H * N * N,
                                      bytes_accessed=bytes_accessed),
    )(q, kv, kv, rel_bias)   # kv passed twice: k-view and v-view index maps


# ----------------------------------------------------------------------------
# Output projection with heads as a grid reduction axis:
#   out = sum_h attn[h] @ proj_w[h] + b        (no transpose of attn needed)
# ----------------------------------------------------------------------------
def _proj_kernel(a_ref, w_ref, b_ref, o_ref):
    @pl.when(pl.program_id(1) == 0)
    def _():
        o_ref[...] = jnp.broadcast_to(b_ref[...], o_ref.shape).astype(o_ref.dtype)
    o_ref[...] += jnp.dot(a_ref[...], w_ref[...],
                          preferred_element_type=jnp.float32)


def pallas_head_proj(a, w_heads, b, out_dtype, *, tile_m=512):
    """a: (heads, M, hd) bf16; w_heads: (heads, hd, C); b: (C,) -> (M, C)."""
    H, M, hd = a.shape
    Hw, hdw, C = w_heads.shape
    assert H == Hw and hd == hdw
    tm = _pick_tile(M, (tile_m, 256, 128, 64, 32, 16, 8))
    flops = 2 * M * hd * H * C
    bytes_accessed = a.size * 2 + w_heads.size * 2 + C * 4 + M * C * 4
    return pl.pallas_call(
        _proj_kernel,
        out_shape=jax.ShapeDtypeStruct((M, C), out_dtype),
        grid=(M // tm, H),                      # heads last: reduction axis
        in_specs=[
            pl.BlockSpec((None, tm, hd), lambda i, h: (h, i, 0)),
            pl.BlockSpec((None, hd, C), lambda i, h: (h, 0, 0)),
            pl.BlockSpec((1, C), lambda i, h: (0, 0)),
        ],
        out_specs=pl.BlockSpec((tm, C), lambda i, h: (i, 0)),   # lane-dense
        compiler_params=pltpu.CompilerParams(
            dimension_semantics=("parallel", "arbitrary"),
            vmem_limit_bytes=_VMEM_LIMIT),
        cost_estimate=pl.CostEstimate(flops=flops, transcendentals=0,
                                      bytes_accessed=bytes_accessed),
    )(a, w_heads.astype(jnp.bfloat16), b.reshape(1, C).astype(jnp.float32))


# ----------------------------------------------------------------------------
# DynamicPosBias (tiny MLP over the (M, 3) bias table) -- plain JAX glue
# ----------------------------------------------------------------------------
def _layernorm(x, gamma, beta, eps=1e-5):
    mu = jnp.mean(x, axis=-1, keepdims=True)
    var = jnp.mean((x - mu) ** 2, axis=-1, keepdims=True)
    return (x - mu) / jnp.sqrt(var + eps) * gamma + beta


def dynamic_pos_bias(biases, p):
    # residual = False:  pos3(pos2(pos1(pos_proj(biases))))
    pos = biases @ p["proj_w"] + p["proj_b"]
    pos = _layernorm(pos, p["ln1_g"], p["ln1_b"])
    pos = jax.nn.relu(pos) @ p["fc1_w"] + p["fc1_b"]
    pos = _layernorm(pos, p["ln2_g"], p["ln2_b"])
    pos = jax.nn.relu(pos) @ p["fc2_w"] + p["fc2_b"]
    pos = _layernorm(pos, p["ln3_g"], p["ln3_b"])
    pos = jax.nn.relu(pos) @ p["fc3_w"] + p["fc3_b"]
    return pos  # (M, num_heads)


# ----------------------------------------------------------------------------
# Parameters / relative-position tables
# ----------------------------------------------------------------------------
def make_params(dim, num_heads, key):
    pos_dim = (dim // 4) // 4
    ks = jax.random.split(key, 8)
    s = 0.02

    def w(k, shape):
        return (s * jax.random.normal(k, shape)).astype(jnp.float32)

    return {
        # nn.Linear(dim, 3*dim): stored transposed -> (dim, 3*dim)
        "qkv_w": w(ks[0], (dim, 3 * dim)),
        "qkv_b": jnp.zeros((3 * dim,), jnp.float32),
        # qkv_y exists in __init__ but the reference forward never uses it.
        "qkv_y_w": w(ks[1], (dim, 3 * dim)),
        "qkv_y_b": jnp.zeros((3 * dim,), jnp.float32),
        "proj_w": w(ks[2], (dim, dim)),
        "proj_b": jnp.zeros((dim,), jnp.float32),
        "pos": {
            "proj_w": w(ks[3], (3, pos_dim)),
            "proj_b": jnp.zeros((pos_dim,), jnp.float32),
            "ln1_g": jnp.ones((pos_dim,), jnp.float32),
            "ln1_b": jnp.zeros((pos_dim,), jnp.float32),
            "fc1_w": w(ks[4], (pos_dim, pos_dim)),
            "fc1_b": jnp.zeros((pos_dim,), jnp.float32),
            "ln2_g": jnp.ones((pos_dim,), jnp.float32),
            "ln2_b": jnp.zeros((pos_dim,), jnp.float32),
            "fc2_w": w(ks[5], (pos_dim, pos_dim)),
            "fc2_b": jnp.zeros((pos_dim,), jnp.float32),
            "ln3_g": jnp.ones((pos_dim,), jnp.float32),
            "ln3_b": jnp.zeros((pos_dim,), jnp.float32),
            "fc3_w": w(ks[6], (pos_dim, num_heads)),
            "fc3_b": jnp.zeros((num_heads,), jnp.float32),
        },
    }


def relative_position_tables(H, W, D):
    """Returns (biases (M,3) float32, relative_position_index (N,N) int32)."""
    ph = jnp.arange(1 - H, H)
    pw = jnp.arange(1 - W, W)
    pd = jnp.arange(1 - D, D)
    biases = jnp.stack(jnp.meshgrid(ph, pw, pd, indexing="ij"))   # (3, 2H-1, 2W-1, 2D-1)
    biases = biases.reshape(3, -1).T.astype(jnp.float32)          # (M, 3)

    ch = jnp.arange(H)
    cw = jnp.arange(W)
    cd = jnp.arange(D)
    coords = jnp.stack(jnp.meshgrid(ch, cw, cd, indexing="ij"))   # (3, H, W, D)
    coords_flat = coords.reshape(3, -1)                           # (3, N)
    rel = coords_flat[:, :, None] - coords_flat[:, None, :]       # (3, N, N)
    rel = rel.transpose(1, 2, 0)                                  # (N, N, 3)
    rel = rel + jnp.array([H - 1, W - 1, D - 1])
    rel = rel * jnp.array([(2 * W - 1) * (2 * D - 1), 2 * D - 1, 1])
    rel_idx = rel.sum(-1).astype(jnp.int32)                       # (N, N)
    return biases, rel_idx


# ----------------------------------------------------------------------------
# CrossAttention forward
# ----------------------------------------------------------------------------
def cross_attention_forward(params, x, y, H, W, D, num_heads):
    B_, N, C = x.shape
    assert H * W * D == N
    head_dim = C // num_heads
    scale = head_dim ** (-0.5)

    # Shared self.qkv is applied to both x and y in the reference; only q(x)
    # and k(y), v(y) are consumed.  Column layout of the 3C output: [3, heads, hd].
    qkv_w, qkv_b = params["qkv_w"], params["qkv_b"]
    # q columns (softmax scale folded in), head-major (heads, C, hd)
    wq = (qkv_w[:, :C] * scale).reshape(C, num_heads, head_dim).transpose(1, 0, 2)
    bq = (qkv_b[:C] * scale).reshape(num_heads, 1, head_dim)
    # k,v columns, head-major (2*heads, C, hd): [k_h0..k_h{H-1} | v_h0..v_h{H-1}]
    wkv = qkv_w[:, C:].reshape(C, 2 * num_heads, head_dim).transpose(1, 0, 2)
    bkv = qkv_b[C:].reshape(2 * num_heads, 1, head_dim)

    # Projections (bf16, head-major) -- q from x, k/v from y only.
    q = pallas_head_linear(x.reshape(B_ * N, C), wq, bq)          # (heads,  B*N, hd)
    kv = pallas_head_linear(y.reshape(B_ * N, C), wkv, bkv)       # (2heads, B*N, hd)
    q = q.reshape(num_heads, B_, N, head_dim)
    kv = kv.reshape(2 * num_heads, B_, N, head_dim)

    # Relative position bias, gathered directly in (heads, N, N) order (bf16).
    biases, rel_idx = relative_position_tables(H, W, D)
    pos = dynamic_pos_bias(biases, params["pos"])                 # (M, heads)
    rel_bias = jnp.take(pos.T, rel_idx.reshape(-1), axis=1)
    rel_bias = rel_bias.reshape(num_heads, N, N).astype(jnp.bfloat16)
    # TODO(synk): cache rel_bias across calls when (H, W, D) and pos params are reused.

    # Attention core: softmax(q*scale @ k_y^T + bias) @ v_y
    # TODO(synk): optional `mask` branch / dropout not implemented (mask=None, p=0.0).
    attn = pallas_cross_attention(q, kv, rel_bias, num_heads)     # (heads, B, N, hd) bf16

    # Output projection: heads consumed as the reduction grid axis -> no transpose,
    # final (B*N, C) store is lane-dense and already in fp32 output dtype.
    proj_w = params["proj_w"].reshape(num_heads, head_dim, C)
    out = pallas_head_proj(attn.reshape(num_heads, B_ * N, head_dim),
                           proj_w, params["proj_b"], x.dtype)
    return out.reshape(B_, N, C)


# ----------------------------------------------------------------------------
if __name__ == "__main__":
    B_ = 2
    H = W = D = 4          # N = 64
    N = H * W * D
    dim = 32
    num_heads = 4

    key = jax.random.PRNGKey(0)
    k_param, k_x, k_y = jax.random.split(key, 3)
    params = make_params(dim, num_heads, k_param)
    x = jax.random.normal(k_x, (B_, N, dim), dtype=jnp.float32)
    y = jax.random.normal(k_y, (B_, N, dim), dtype=jnp.float32)

    fwd = jax.jit(functools.partial(cross_attention_forward,
                                    H=H, W=W, D=D, num_heads=num_heads))
    out = fwd(params, x, y)
    out = jax.block_until_ready(out)
    assert out.shape == (B_, N, dim)
    assert bool(jnp.all(jnp.isfinite(out)))
    print("KERNEL_OK")
</pallas_src>

<mosaic_0001>
module attributes {stable_mosaic.version = 11 : i64} {
  func.func @_head_linear_kernel(%arg0: i32, %arg1: i32, %arg2: memref<128x32xf32, #tpu.memory_space<vmem>>, %arg3: memref<1x32x8xbf16, #tpu.memory_space<vmem>>, %arg4: memref<1x1x8xf32, #tpu.memory_space<vmem>>, %arg5: memref<1x128x8xbf16, #tpu.memory_space<vmem>>) attributes {dimension_semantics = [#tpu.dimension_semantics<parallel>, #tpu.dimension_semantics<parallel>], iteration_bounds = array<i64: 1, 4>, scalar_prefetch = 0 : i64, scratch_operands = 0 : i64, tpu.core_type = #tpu.core_type<tc>, window_params = [{transform_indices = @transform_0, window_bounds = array<i64: 128, 32>}, {transform_indices = @transform_1, window_bounds = array<i64: 1, 32, 8>}, {transform_indices = @transform_2, window_bounds = array<i64: 1, 1, 8>}, {transform_indices = @transform_3, window_bounds = array<i64: 1, 128, 8>}]} {
    %c0 = arith.constant 0 : index
    %c0_0 = arith.constant 0 : index
    %0 = vector.load %arg2[%c0, %c0_0] : memref<128x32xf32, #tpu.memory_space<vmem>>, vector<128x32xf32>
    %1 = arith.truncf %0 : vector<128x32xf32> to vector<128x32xbf16>
    %c0_1 = arith.constant 0 : index
    %c0_2 = arith.constant 0 : index
    %c0_3 = arith.constant 0 : index
    %2 = vector.load %arg3[%c0_1, %c0_2, %c0_3] : memref<1x32x8xbf16, #tpu.memory_space<vmem>>, vector<1x32x8xbf16>
    %3 = vector.shape_cast %2 : vector<1x32x8xbf16> to vector<32x8xbf16>
    %cst = arith.constant dense<0.000000e+00> : vector<128x8xf32>
    %4 = tpu.matmul %1, %3, %cst {dimension_numbers = #tpu.dot_dimension_numbers<[1], [0], [0], [1], [0, 0, 1, 1], [], []>} : vector<128x32xbf16>, vector<32x8xbf16>, vector<128x8xf32> -> vector<128x8xf32>
    %c0_4 = arith.constant 0 : index
    %c0_5 = arith.constant 0 : index
    %c0_6 = arith.constant 0 : index
    %5 = vector.load %arg4[%c0_4, %c0_5, %c0_6] : memref<1x1x8xf32, #tpu.memory_space<vmem>>, vector<1x1x8xf32>
    %6 = vector.shape_cast %5 : vector<1x1x8xf32> to vector<1x8xf32>
    %7 = vector.broadcast %6 : vector<1x8xf32> to vector<128x8xf32>
    %8 = arith.addf %4, %7 : vector<128x8xf32>
    %9 = arith.truncf %8 : vector<128x8xf32> to vector<128x8xbf16>
    %c0_7 = arith.constant 0 : index
    %c0_8 = arith.constant 0 : index
    %c0_9 = arith.constant 0 : index
    %10 = vector.load %arg5[%c0_7, %c0_8, %c0_9] : memref<1x128x8xbf16, #tpu.memory_space<vmem>>, vector<1x128x8xbf16>
    %11 = vector.shape_cast %10 : vector<1x128x8xbf16> to vector<128x8xbf16>
    %12 = vector.shape_cast %9 : vector<128x8xbf16> to vector<1x128x8xbf16>
    tpu.vector_store %arg5[%c0_7, %c0_8, %c0_9], %12 {strides = array<i32>} : memref<1x128x8xbf16, #tpu.memory_space<vmem>>, vector<1x128x8xbf16>,
    return
  }
  func.func @transform_0(%arg0: i32, %arg1: i32) -> (i32, i32) {
    %c0_i32 = arith.constant 0 : i32
    %c0_i32_0 = arith.constant 0 : i32
    return %arg0, %c0_i32 : i32, i32
  }
  func.func @transform_1(%arg0: i32, %arg1: i32) -> (i32, i32, i32) {
    %c0_i32 = arith.constant 0 : i32
    %c0_i32_0 = arith.constant 0 : i32
    %c0_i32_1 = arith.constant 0 : i32
    return %arg1, %c0_i32, %c0_i32_0 : i32, i32, i32
  }
  func.func @transform_2(%arg0: i32, %arg1: i32) -> (i32, i32, i32) {
    %c0_i32 = arith.constant 0 : i32
    %c0_i32_0 = arith.constant 0 : i32
    %c0_i32_1 = arith.constant 0 : i32
    return %arg1, %c0_i32, %c0_i32_0 : i32, i32, i32
  }
  func.func @transform_3(%arg0: i32, %arg1: i32) -> (i32, i32, i32) {
    %c0_i32 = arith.constant 0 : i32
    %c0_i32_0 = arith.constant 0 : i32
    return %arg1, %arg0, %c0_i32 : i32, i32, i32
  }
}

module attributes {stable_mosaic.version = 11 : i64} {
  func.func @_head_linear_kernel(%arg0: i32, %arg1: i32, %arg2: memref<128x32xf32, #tpu.memory_space<vmem>>, %arg3: memref<1x32x8xbf16, #tpu.memory_space<vmem>>, %arg4: memref<1x1x8xf32, #tpu.memory_space<vmem>>, %arg5: memref<1x128x8xbf16, #tpu.memory_space<vmem>>) attributes {dimension_semantics = [#tpu.dimension_semantics<parallel>, #tpu.dimension_semantics<parallel>], iteration_bounds = array<i64: 1, 8>, scalar_prefetch = 0 : i64, scratch_operands = 0 : i64, tpu.core_type = #tpu.core_type<tc>, window_params = [{transform_indices = @transform_0, window_bounds = array<i64: 128, 32>}, {transform_indices = @transform_1, window_bounds = array<i64: 1, 32, 8>}, {transform_indices = @transform_2, window_bounds = array<i64: 1, 1, 8>}, {transform_indices = @transform_3, window_bounds = array<i64: 1, 128, 8>}]} {
    %c0 = arith.constant 0 : index
    %c0_0 = arith.constant 0 : index
    %0 = vector.load %arg2[%c0, %c0_0] : memref<128x32xf32, #tpu.memory_space<vmem>>, vector<128x32xf32>
    %1 = arith.truncf %0 : vector<128x32xf32> to vector<128x32xbf16>
    %c0_1 = arith.constant 0 : index
    %c0_2 = arith.constant 0 : index
    %c0_3 = arith.constant 0 : index
    %2 = vector.load %arg3[%c0_1, %c0_2, %c0_3] : memref<1x32x8xbf16, #tpu.memory_space<vmem>>, vector<1x32x8xbf16>
    %3 = vector.shape_cast %2 : vector<1x32x8xbf16> to vector<32x8xbf16>
    %cst = arith.constant dense<0.000000e+00> : vector<128x8xf32>
    %4 = tpu.matmul %1, %3, %cst {dimension_numbers = #tpu.dot_dimension_numbers<[1], [0], [0], [1], [0, 0, 1, 1], [], []>} : vector<128x32xbf16>, vector<32x8xbf16>, vector<128x8xf32> -> vector<128x8xf32>
    %c0_4 = arith.constant 0 : index
    %c0_5 = arith.constant 0 : index
    %c0_6 = arith.constant 0 : index
    %5 = vector.load %arg4[%c0_4, %c0_5, %c0_6] : memref<1x1x8xf32, #tpu.memory_space<vmem>>, vector<1x1x8xf32>
    %6 = vector.shape_cast %5 : vector<1x1x8xf32> to vector<1x8xf32>
    %7 = vector.broadcast %6 : vector<1x8xf32> to vector<128x8xf32>
    %8 = arith.addf %4, %7 : vector<128x8xf32>
    %9 = arith.truncf %8 : vector<128x8xf32> to vector<128x8xbf16>
    %c0_7 = arith.constant 0 : index
    %c0_8 = arith.constant 0 : index
    %c0_9 = arith.constant 0 : index
    %10 = vector.load %arg5[%c0_7, %c0_8, %c0_9] : memref<1x128x8xbf16, #tpu.memory_space<vmem>>, vector<1x128x8xbf16>
    %11 = vector.shape_cast %10 : vector<1x128x8xbf16> to vector<128x8xbf16>
    %12 = vector.shape_cast %9 : vector<128x8xbf16> to vector<1x128x8xbf16>
    tpu.vector_store %arg5[%c0_7, %c0_8, %c0_9], %12 {strides = array<i32>} : memref<1x128x8xbf16, #tpu.memory_space<vmem>>, vector<1x128x8xbf16>,
    return
  }
  func.func @transform_0(%arg0: i32, %arg1: i32) -> (i32, i32) {
    %c0_i32 = arith.constant 0 : i32
    %c0_i32_0 = arith.constant 0 : i32
    return %arg0, %c0_i32 : i32, i32
  }
  func.func @transform_1(%arg0: i32, %arg1: i32) -> (i32, i32, i32) {
    %c0_i32 = arith.constant 0 : i32
    %c0_i32_0 = arith.constant 0 : i32
    %c0_i32_1 = arith.constant 0 : i32
    return %arg1, %c0_i32, %c0_i32_0 : i32, i32, i32
  }
  func.func @transform_2(%arg0: i32, %arg1: i32) -> (i32, i32, i32) {
    %c0_i32 = arith.constant 0 : i32
    %c0_i32_0 = arith.constant 0 : i32
    %c0_i32_1 = arith.constant 0 : i32
    return %arg1, %c0_i32, %c0_i32_0 : i32, i32, i32
  }
  func.func @transform_3(%arg0: i32, %arg1: i32) -> (i32, i32, i32) {
    %c0_i32 = arith.constant 0 : i32
    %c0_i32_0 = arith.constant 0 : i32
    return %arg1, %arg0, %c0_i32 : i32, i32, i32
  }
}

module attributes {stable_mosaic.version = 11 : i64} {
  func.func @_attn_kernel(%arg0: i32, %arg1: i32, %arg2: i32, %arg3: memref<1x1x64x8xbf16, #tpu.memory_space<vmem>>, %arg4: memref<1x1x64x8xbf16, #tpu.memory_space<vmem>>, %arg5: memref<1x1x64x8xbf16, #tpu.memory_space<vmem>>, %arg6: memref<1x64x64xbf16, #tpu.memory_space<vmem>>, %arg7: memref<1x1x64x8xbf16, #tpu.memory_space<vmem>>) attributes {dimension_semantics = [#tpu.dimension_semantics<parallel>, #tpu.dimension_semantics<parallel>, #tpu.dimension_semantics<parallel>], iteration_bounds = array<i64: 2, 4, 1>, scalar_prefetch = 0 : i64, scratch_operands = 0 : i64, tpu.core_type = #tpu.core_type<tc>, window_params = [{transform_indices = @transform_0, window_bounds = array<i64: 1, 1, 64, 8>}, {transform_indices = @transform_1, window_bounds = array<i64: 1, 1, 64, 8>}, {transform_indices = @transform_2, window_bounds = array<i64: 1, 1, 64, 8>}, {transform_indices = @transform_3, window_bounds = array<i64: 1, 64, 64>}, {transform_indices = @transform_4, window_bounds = array<i64: 1, 1, 64, 8>}]} {
    %c0 = arith.constant 0 : index
    %c0_0 = arith.constant 0 : index
    %c0_1 = arith.constant 0 : index
    %c0_2 = arith.constant 0 : index
    %0 = vector.load %arg3[%c0, %c0_0, %c0_1, %c0_2] : memref<1x1x64x8xbf16, #tpu.memory_space<vmem>>, vector<1x1x64x8xbf16>
    %1 = vector.shape_cast %0 : vector<1x1x64x8xbf16> to vector<64x8xbf16>
    %c0_3 = arith.constant 0 : index
    %c0_4 = arith.constant 0 : index
    %c0_5 = arith.constant 0 : index
    %c0_6 = arith.constant 0 : index
    %2 = vector.load %arg4[%c0_3, %c0_4, %c0_5, %c0_6] : memref<1x1x64x8xbf16, #tpu.memory_space<vmem>>, vector<1x1x64x8xbf16>
    %3 = vector.shape_cast %2 : vector<1x1x64x8xbf16> to vector<64x8xbf16>
    %cst = arith.constant dense<0.000000e+00> : vector<64x64xf32>
    %4 = tpu.matmul %1, %3, %cst {dimension_numbers = #tpu.dot_dimension_numbers<[1], [1], [0], [0], [0, 0, 1, 0], [], []>} : vector<64x8xbf16>, vector<64x8xbf16>, vector<64x64xf32> -> vector<64x64xf32>
    %c0_7 = arith.constant 0 : index
    %c0_8 = arith.constant 0 : index
    %c0_9 = arith.constant 0 : index
    %5 = vector.load %arg6[%c0_7, %c0_8, %c0_9] : memref<1x64x64xbf16, #tpu.memory_space<vmem>>, vector<1x64x64xbf16>
    %6 = vector.shape_cast %5 : vector<1x64x64xbf16> to vector<64x64xbf16>
    %7 = arith.extf %6 : vector<64x64xbf16> to vector<64x64xf32>
    %8 = arith.addf %4, %7 : vector<64x64xf32>
    %cst_10 = arith.constant dense<0xFF800000> : vector<64xf32>
    %9 = vector.multi_reduction <maximumf>, %8, %cst_10 [1] : vector<64x64xf32> to vector<64xf32>
    %10 = vector.shape_cast %9 : vector<64xf32> to vector<64x1xf32>
    %11 = vector.broadcast %10 : vector<64x1xf32> to vector<64x64xf32>
    %12 = arith.subf %8, %11 : vector<64x64xf32>
    %13 = math.exp %12 : vector<64x64xf32>
    %cst_11 = arith.constant dense<0.000000e+00> : vector<64xf32>
    %14 = vector.multi_reduction <add>, %13, %cst_11 [1] : vector<64x64xf32> to vector<64xf32>
    %15 = vector.shape_cast %14 : vector<64xf32> to vector<64x1xf32>
    %16 = tpu.reciprocal %15 {approx = true} : vector<64x1xf32> -> vector<64x1xf32>
    %17 = vector.broadcast %16 : vector<64x1xf32> to vector<64x64xf32>
    %18 = arith.mulf %13, %17 : vector<64x64xf32>
    %19 = arith.truncf %18 : vector<64x64xf32> to vector<64x64xbf16>
    %c0_12 = arith.constant 0 : index
    %c0_13 = arith.constant 0 : index
    %c0_14 = arith.constant 0 : index
    %c0_15 = arith.constant 0 : index
    %20 = vector.load %arg5[%c0_12, %c0_13, %c0_14, %c0_15] : memref<1x1x64x8xbf16, #tpu.memory_space<vmem>>, vector<1x1x64x8xbf16>
    %21 = vector.shape_cast %20 : vector<1x1x64x8xbf16> to vector<64x8xbf16>
    %cst_16 = arith.constant dense<0.000000e+00> : vector<64x8xf32>
    %22 = tpu.matmul %19, %21, %cst_16 {dimension_numbers = #tpu.dot_dimension_numbers<[1], [0], [0], [1], [0, 0, 1, 1], [], []>} : vector<64x64xbf16>, vector<64x8xbf16>, vector<64x8xf32> -> vector<64x8xf32>
    %23 = arith.truncf %22 : vector<64x8xf32> to vector<64x8xbf16>
    %c0_17 = arith.constant 0 : index
    %c0_18 = arith.constant 0 : index
    %c0_19 = arith.constant 0 : index
    %c0_20 = arith.constant 0 : index
    %24 = vector.load %arg7[%c0_17, %c0_18, %c0_19, %c0_20] : memref<1x1x64x8xbf16, #tpu.memory_space<vmem>>, vector<1x1x64x8xbf16>
    %25 = vector.shape_cast %24 : vector<1x1x64x8xbf16> to vector<64x8xbf16>
    %26 = vector.shape_cast %23 : vector<64x8xbf16> to vector<1x1x64x8xbf16>
    tpu.vector_store %arg7[%c0_17, %c0_18, %c0_19, %c0_20], %26 {strides = array<i32>} : memref<1x1x64x8xbf16, #tpu.memory_space<vmem>>, vector<1x1x64x8xbf16>,
    return
  }
  func.func @transform_0(%arg0: i32, %arg1: i32, %arg2: i32) -> (i32, i32, i32, i32) {
    %c0_i32 = arith.constant 0 : i32
    %c0_i32_0 = arith.constant 0 : i32
    return %arg1, %arg0, %arg2, %c0_i32 : i32, i32, i32, i32
  }
  func.func @transform_1(%arg0: i32, %arg1: i32, %arg2: i32) -> (i32, i32, i32, i32) {
    %c0_i32 = arith.constant 0 : i32
    %c0_i32_0 = arith.constant 0 : i32
    %c0_i32_1 = arith.constant 0 : i32
    return %arg1, %arg0, %c0_i32, %c0_i32_0 : i32, i32, i32, i32
  }
  func.func @transform_2(%arg0: i32, %arg1: i32, %arg2: i32) -> (i32, i32, i32, i32) {
    %c4_i32 = arith.constant 4 : i32
    %0 = arith.addi %arg1, %c4_i32 : i32
    %c0_i32 = arith.constant 0 : i32
    %c0_i32_0 = arith.constant 0 : i32
    %c0_i32_1 = arith.constant 0 : i32
    return %0, %arg0, %c0_i32, %c0_i32_0 : i32, i32, i32, i32
  }
  func.func @transform_3(%arg0: i32, %arg1: i32, %arg2: i32) -> (i32, i32, i32) {
    %c0_i32 = arith.constant 0 : i32
    %c0_i32_0 = arith.constant 0 : i32
    return %arg1, %arg2, %c0_i32 : i32, i32, i32
  }
  func.func @transform_4(%arg0: i32, %arg1: i32, %arg2: i32) -> (i32, i32, i32, i32) {
    %c0_i32 = arith.constant 0 : i32
    %c0_i32_0 = arith.constant 0 : i32
    return %arg1, %arg0, %arg2, %c0_i32 : i32, i32, i32, i32
  }
}

module attributes {stable_mosaic.version = 11 : i64} {
  func.func @_proj_kernel(%arg0: i32, %arg1: i32, %arg2: memref<1x128x8xbf16, #tpu.memory_space<vmem>>, %arg3: memref<1x8x32xbf16, #tpu.memory_space<vmem>>, %arg4: memref<1x32xf32, #tpu.memory_space<vmem>>, %arg5: memref<128x32xf32, #tpu.memory_space<vmem>>) attributes {dimension_semantics = [#tpu.dimension_semantics<parallel>, #tpu.dimension_semantics<arbitrary>], iteration_bounds = array<i64: 1, 4>, scalar_prefetch = 0 : i64, scratch_operands = 0 : i64, tpu.core_type = #tpu.core_type<tc>, window_params = [{transform_indices = @transform_0, window_bounds = array<i64: 1, 128, 8>}, {transform_indices = @transform_1, window_bounds = array<i64: 1, 8, 32>}, {pipeline_mode = #tpu.pipeline_mode<synchronous>, transform_indices = @transform_2, window_bounds = array<i64: 1, 32>}, {transform_indices = @transform_3, window_bounds = array<i64: 128, 32>}]} {
    %c0_i32 = arith.constant 0 : i32
    %0 = arith.cmpi eq, %arg1, %c0_i32 : i32
    %1 = arith.extui %0 : i1 to i32
    %c0_i32_0 = arith.constant 0 : i32
    %2 = arith.cmpi ne, %1, %c0_i32_0 : i32
    scf.if %2 {
      %c0_10 = arith.constant 0 : index
      %c0_11 = arith.constant 0 : index
      %11 = vector.load %arg4[%c0_10, %c0_11] : memref<1x32xf32, #tpu.memory_space<vmem>>, vector<1x32xf32>
      %12 = vector.shape_cast %11 : vector<1x32xf32> to vector<1x32xf32>
      %13 = vector.broadcast %12 : vector<1x32xf32> to vector<128x32xf32>
      %c0_12 = arith.constant 0 : index
      %c0_13 = arith.constant 0 : index
      %14 = vector.load %arg5[%c0_12, %c0_13] : memref<128x32xf32, #tpu.memory_space<vmem>>, vector<128x32xf32>
      tpu.vector_store %arg5[%c0_12, %c0_13], %13 {strides = array<i32>} : memref<128x32xf32, #tpu.memory_space<vmem>>, vector<128x32xf32>,
    } else {
    }
    %c0 = arith.constant 0 : index
    %c0_1 = arith.constant 0 : index
    %3 = vector.load %arg5[%c0, %c0_1] : memref<128x32xf32, #tpu.memory_space<vmem>>, vector<128x32xf32>
    %c0_2 = arith.constant 0 : index
    %c0_3 = arith.constant 0 : index
    %c0_4 = arith.constant 0 : index
    %4 = vector.load %arg2[%c0_2, %c0_3, %c0_4] : memref<1x128x8xbf16, #tpu.memory_space<vmem>>, vector<1x128x8xbf16>
    %5 = vector.shape_cast %4 : vector<1x128x8xbf16> to vector<128x8xbf16>
    %c0_5 = arith.constant 0 : index
    %c0_6 = arith.constant 0 : index
    %c0_7 = arith.constant 0 : index
    %6 = vector.load %arg3[%c0_5, %c0_6, %c0_7] : memref<1x8x32xbf16, #tpu.memory_space<vmem>>, vector<1x8x32xbf16>
    %7 = vector.shape_cast %6 : vector<1x8x32xbf16> to vector<8x32xbf16>
    %cst = arith.constant dense<0.000000e+00> : vector<128x32xf32>
    %8 = tpu.matmul %5, %7, %cst {dimension_numbers = #tpu.dot_dimension_numbers<[1], [0], [0], [1], [0, 0, 1, 1], [], []>} : vector<128x8xbf16>, vector<8x32xbf16>, vector<128x32xf32> -> vector<128x32xf32>
    %9 = arith.addf %3, %8 : vector<128x32xf32>
    %c0_8 = arith.constant 0 : index
    %c0_9 = arith.constant 0 : index
    %10 = vector.load %arg5[%c0_8, %c0_9] : memref<128x32xf32, #tpu.memory_space<vmem>>, vector<128x32xf32>
    tpu.vector_store %arg5[%c0_8, %c0_9], %9 {strides = array<i32>} : memref<128x32xf32, #tpu.memory_space<vmem>>, vector<128x32xf32>,
    return
  }
  func.func @transform_0(%arg0: i32, %arg1: i32) -> (i32, i32, i32) {
    %c0_i32 = arith.constant 0 : i32
    %c0_i32_0 = arith.constant 0 : i32
    return %arg1, %arg0, %c0_i32 : i32, i32, i32
  }
  func.func @transform_1(%arg0: i32, %arg1: i32) -> (i32, i32, i32) {
    %c0_i32 = arith.constant 0 : i32
    %c0_i32_0 = arith.constant 0 : i32
    %c0_i32_1 = arith.constant 0 : i32
    return %arg1, %c0_i32, %c0_i32_0 : i32, i32, i32
  }
  func.func @transform_2(%arg0: i32, %arg1: i32) -> (i32, i32) {
    %c0_i32 = arith.constant 0 : i32
    %c0_i32_0 = arith.constant 0 : i32
    %c0_i32_1 = arith.constant 0 : i32
    return %c0_i32, %c0_i32_0 : i32, i32
  }
  func.func @transform_3(%arg0: i32, %arg1: i32) -> (i32, i32) {
    %c0_i32 = arith.constant 0 : i32
    %c0_i32_0 = arith.constant 0 : i32
    return %arg0, %c0_i32 : i32, i32
  }
}

</mosaic_0001>

<bundles_post_ra>
// kernel: sub.32
= control target key start
LH: loop header
LB: loop body
LE: loop exit
PB: predicated region body
PF: predicated region fallthrough
CT: control target
= control target key end

     0   :  { %vm63_vm0 = vcmask 1041409   ;;  %vm67_vm1 = vcmask 1042434   ;;  %s324_s30 = smov 52   ;;  %s325_s2 = smov 56   ;;  %vm69_vm2 = vcmask 31744   ;;  %vm83_vm3 = vcmask 523744   ;;  %s420_s0 = inlined_call_operand.vmem [shape: s32[3,4,4,4], index: 0, kind: input, shape index: {}]   ;;  %s421_s1 = inlined_call_operand.vmem [shape: s32[3,64], index: 1, kind: output, shape index: {}]  }
   0x1   :  { %v297_v0 = vld [vmem:[%s420_s0 + $0x2c] sm:$0xf]  ;;  %v301_v1 = vld [vmem:[%s420_s0 + $0x1c] sm:$0xf]  ;;  %v298_v3 = vld [vmem:[%s420_s0 + $0x28] sm:$0xf] }
   0x2   :  { %v305_v2 = vld [vmem:[%s420_s0 + $0xc] sm:$0xf]  ;;  %8 = vst [vmem:[#allocation1 + $0x58] sm:$0xf] %v297_v0  ;;  %28 = vst [vmem:[#allocation1 + $0x38] sm:$0xf] %v301_v1 }
   0x3   :  { %48 = vst [vmem:[#allocation1 + $0x18] sm:$0xf] %v305_v2  ;;  %13 = vst [vmem:[#allocation1 + $0x50] sm:$0xf] %v298_v3  ;;  %v302_v4 = vld [vmem:[%s420_s0 + $0x18] sm:$0xf] }
   0x4   :  { %v306_v5 = vld [vmem:[%s420_s0 + $0x8] sm:$0xf]  ;;  %33 = vst [vmem:[#allocation1 + $0x30] sm:$0xf] %v302_v4  ;;  %v299_v6 = vld [vmem:[%s420_s0 + $0x24] sm:$0xf] }
   0x5   :  { %53 = vst [vmem:[#allocation1 + $0x10] sm:$0xf] %v306_v5  ;;  %v303_v7 = vld [vmem:[%s420_s0 + $0x14] sm:$0xf]  ;;  %18 = vst [vmem:[#allocation1 + $0x48] sm:$0xf] %v299_v6 }
   0x6   :  { %38 = vst [vmem:[#allocation1 + $0x28] sm:$0xf] %v303_v7  ;;  %v307_v8 = vld [vmem:[%s420_s0 + $0x4] sm:$0xf]  ;;  %v300_v9 = vld [vmem:[%s420_s0 + $0x20] sm:$0xf] }
   0x7   :  { %57 = vst [vmem:[#allocation1 + $0x8] sm:$0xf] %v307_v8  ;;  %23 = vst [vmem:[#allocation1 + $0x40] sm:$0xf] %v300_v9  ;;  %v304_v10 = vld [vmem:[%s420_s0 + $0x10] sm:$0xf] }
   0x8   :  { %v58_v11 = vld [vmem:[%s420_s0] sm:$0xf]  ;;  %43 = vst [vmem:[#allocation1 + $0x20] sm:$0xf] %v304_v10  ;;  %s323_s0 = smov 60   ;;  %s326_s3 = smov 48  }
   0x9   :  { %59 = vst [vmem:[#allocation1] sm:$0xf] %v58_v11  ;;  %v74_v13 = vld [vmem:[#allocation1 + $0x3a] sm:$0x2]   ;;  %v102_v17 = vld [vmem:[#allocation1 + $0x38] sm:$0x2]  }
   0xa   :  { %v72_v12 = vld [vmem:[#allocation1 + $0x1b] sm:$0x1]   ;;  %v100_v16 = vld [vmem:[#allocation1 + $0x19] sm:$0x1]   ;;  %v86_v21 = vld [vmem:[#allocation1 + $0x1a] sm:$0x1]  }
   0xb   :  { %v78_v14 = vld [vmem:[#allocation1 + $0x59] sm:$0x4]   ;;  %v76_v15 = vsel %vm63_vm0, %v74_v13, %v72_v12  ;;  %v106_v18 = vld [vmem:[#allocation1 + $0x57] sm:$0x4]   ;;  %v104_v20 = vsel %vm63_vm0, %v102_v17, %v100_v16  ;;  %v88_v22 = vld [vmem:[#allocation1 + $0x39] sm:$0x2]  }
   0xc   :  { %v80_v19 = vsel %vm67_vm1, %v78_v14, %v76_v15  ;;  %v92_v23 = vld [vmem:[#allocation1 + $0x58] sm:$0x4]   ;;  %v108_v24 = vsel %vm67_vm1, %v106_v18, %v104_v20  ;;  %v90_v25 = vsel %vm63_vm0, %v88_v22, %v86_v21  ;;  %v114_v26 = vld [vmem:[#allocation1 + $0x18] sm:$0x1]   ;;  %v128_v31 = vld [vmem:[#allocation1 + $0x13] sm:$0x1]  }
   0xd   :  { %81 = vrot.lane.b32.xlu0 %v80_v19, %s323_s0  ;;  %v116_v27 = vld [vmem:[#allocation1 + $0x37] sm:$0x2]   ;;  %109 = vrot.lane.b32.xlu1 %v108_v24, %s324_s30  ;;  %v94_v29 = vsel %vm67_vm1, %v92_v23, %v90_v25  ;;  %v130_v32 = vld [vmem:[#allocation1 + $0x32] sm:$0x2]   ;;  %v142_v36 = vld [vmem:[#allocation1 + $0x12] sm:$0x1]  }
   0xe   :  { %v120_v28 = vld [vmem:[#allocation1 + $0x56] sm:$0x4]   ;;  %v118_v30 = vsel %vm63_vm0, %v116_v27, %v114_v26  ;;  %v132_v34 = vsel %vm63_vm0, %v130_v32, %v128_v31  ;;  %v134_v35 = vld [vmem:[#allocation1 + $0x51] sm:$0x4]   ;;  %v144_v37 = vld [vmem:[#allocation1 + $0x31] sm:$0x2]  }
   0xf   :  { %v122_v33 = vsel %vm67_vm1, %v120_v28, %v118_v30  ;;  %v146_v38 = vsel %vm63_vm0, %v144_v37, %v142_v36  ;;  %v148_v39 = vld [vmem:[#allocation1 + $0x50] sm:$0x4]   ;;  %v156_v40 = vld [vmem:[#allocation1 + $0x11] sm:$0x1]   ;;  %v170_v42 = vld [vmem:[#allocation1 + $0x10] sm:$0x1]   ;;  %v136_v44 = vsel %vm67_vm1, %v134_v35, %v132_v34 }
  0x10   :  { %v158_v41 = vld [vmem:[#allocation1 + $0x30] sm:$0x2]   ;;  %v172_v43 = vld [vmem:[#allocation1 + $0x2f] sm:$0x2]   ;;  %v150_v45 = vsel %vm67_vm1, %v148_v39, %v146_v38  ;;  %v184_v50 = vld [vmem:[#allocation1 + $0xb] sm:$0x1]  }
  0x11   :  { %95 = vrot.lane.b32.xlu0 %v94_v29, %s325_s2  ;;  %123 = vrot.lane.b32.xlu1 %v122_v33, %s326_s3  ;;  %v160_v46 = vsel %vm63_vm0, %v158_v41, %v156_v40  ;;  %v162_v47 = vld [vmem:[#allocation1 + $0x4f] sm:$0x4]   ;;  %v174_v48 = vsel %vm63_vm0, %v172_v43, %v170_v42  ;;  %v176_v49 = vld [vmem:[#allocation1 + $0x4e] sm:$0x4]   ;;  %v186_v51 = vld [vmem:[#allocation1 + $0x2a] sm:$0x2]  }
  0x12   :  { %s327_s4 = smov 44   ;;  %v198_v52 = vld [vmem:[#allocation1 + $0xa] sm:$0x1]   ;;  %s328_s5 = smov 40   ;;  %v164_v54 = vsel %vm67_vm1, %v162_v47, %v160_v46  ;;  %v178_v55 = vsel %vm67_vm1, %v176_v49, %v174_v48  ;;  %v188_v56 = vsel %vm63_vm0, %v186_v51, %v184_v50  ;;  %v190_v57 = vld [vmem:[#allocation1 + $0x49] sm:$0x4]  }
  0x13   :  { %v200_v53 = vld [vmem:[#allocation1 + $0x29] sm:$0x2]   ;;  %v212_v60 = vld [vmem:[#allocation1 + $0x9] sm:$0x1]   ;;  %v226_v62 = vld [vmem:[#allocation1 + $0x8] sm:$0x1]   ;;  %v192_v2 = vsel %vm67_vm1, %v190_v57, %v188_v56 }
  0x14   :  { %v204_v58 = vld [vmem:[#allocation1 + $0x48] sm:$0x4]   ;;  %v202_v59 = vsel %vm63_vm0, %v200_v53, %v198_v52  ;;  %v214_v61 = vld [vmem:[#allocation1 + $0x28] sm:$0x2]   ;;  %s329_s6 = smov 36   ;;  %s330_s7 = smov 32  }
  0x15   :  { %137 = vrot.lane.b32.xlu0 %v136_v44, %s327_s4  ;;  %151 = vrot.lane.b32.xlu1 %v150_v45, %s328_s5  ;;  %v228_v63 = vld [vmem:[#allocation1 + $0x27] sm:$0x2]   ;;  %v60_v0 = vld [vmem:[#allocation1] sm:$0x1]   ;;  %v206_v5 = vsel %vm67_vm1, %v204_v58, %v202_v59  ;;  %v216_v6 = vsel %vm63_vm0, %v214_v61, %v212_v60  ;;  %v218_v7 = vld [vmem:[#allocation1 + $0x47] sm:$0x4]  }
  0x16   :  { %v62_v1 = vld [vmem:[#allocation1 + $0x1f] sm:$0x2]   ;;  %v230_v9 = vsel %vm63_vm0, %v228_v63, %v226_v62  ;;  %v232_v10 = vld [vmem:[#allocation1 + $0x46] sm:$0x4]   ;;  %v240_v11 = vld [vmem:[#allocation1 + $0x3] sm:$0x1]   ;;  %v220_v15 = vsel %vm67_vm1, %v218_v7, %v216_v6 }
  0x17   :  { %v64_v3 = vsel %vm63_vm0, %v62_v1, %v60_v0  ;;  %v66_v4 = vld [vmem:[#allocation1 + $0x3e] sm:$0x4]   ;;  %v242_v12 = vld [vmem:[#allocation1 + $0x22] sm:$0x2]   ;;  %s331_s8 = smov 28   ;;  %s332_s9 = smov 24   ;;  %v234_v16 = vsel %vm67_vm1, %v232_v10, %v230_v9 }
  0x18   :  { %v68_v8 = vsel %vm67_vm1, %v66_v4, %v64_v3  ;;  %v254_v13 = vld [vmem:[#allocation1 + $0x2] sm:$0x1]   ;;  %v244_v17 = vsel %vm63_vm0, %v242_v12, %v240_v11  ;;  %v246_v18 = vld [vmem:[#allocation1 + $0x41] sm:$0x4]   ;;  %v268_v21 = vld [vmem:[#allocation1 + $0x1] sm:$0x1]  }
  0x19   :  { %165 = vrot.lane.b32.xlu0 %v164_v54, %s329_s6  ;;  %179 = vrot.lane.b32.xlu1 %v178_v55, %s330_s7  ;;  %70 = vst.msk [vmem:[#allocation0] sm:$0x7] %vm69_vm2, %v68_v8   ;;  %v256_v14 = vld [vmem:[#allocation1 + $0x21] sm:$0x2]   ;;  %v270_v22 = vld [vmem:[#allocation1 + $0x20] sm:$0x2]   ;;  %v248_v23 = vsel %vm67_vm1, %v246_v18, %v244_v17 }
  0x1a   :  { %v258_v19 = vsel %vm63_vm0, %v256_v14, %v254_v13  ;;  %v260_v20 = vld [vmem:[#allocation1 + $0x40] sm:$0x4]   ;;  %s333_s10 = smov 20   ;;  %s334_s11 = smov 16   ;;  %v272_v25 = vsel %vm63_vm0, %v270_v22, %v268_v21  ;;  %v274_v26 = vld [vmem:[#allocation1 + $0x3f] sm:$0x4]  }
  0x1b   :  { %v262_v24 = vsel %vm67_vm1, %v260_v20, %v258_v19  ;;  %s335_s12 = smov 12   ;;  %s336_s13 = smov 8   ;;  %v276_v27 = vsel %vm67_vm1, %v274_v26, %v272_v25  ;;  %vm97_vm4 = vcmask 490944   ;;  %vm111_vm5 = vcmask 458144  }
  0x1c   :  { %s337_s14 = smov 4   ;;  %vm125_vm6 = vcmask 425344   ;;  %vm139_vm7 = vcmask 392544   ;;  %vm153_vm8 = vcmask 359744   ;;  %vm167_vm9 = vcmask 326944  }
  0x1d   :  { %193 = vrot.lane.b32.xlu0 %v192_v2, %s331_s8  ;;  %207 = vrot.lane.b32.xlu1 %v206_v5, %s332_s9  ;;  %vm181_vm10 = vcmask 294144   ;;  %vm195_vm11 = vcmask 261344   ;;  %vm209_vm12 = vcmask 228544   ;;  %vm223_vm13 = vcmask 195744  }
  0x1e   :  { %vm237_vm14 = vcmask 162944   ;;  %vm251_vm15 = vcmask 130144   ;;  %vm265_vm0 = vcmask 97344   ;;  %vm279_vm1 = vcmask 64544  }
  0x21   :  { %221 = vrot.lane.b32.xlu0 %v220_v15, %s333_s10  ;;  %235 = vrot.lane.b32.xlu1 %v234_v16, %s334_s11 }
  0x25   :  { %249 = vrot.lane.b32.xlu0 %v248_v23, %s335_s12  ;;  %263 = vrot.lane.b32.xlu1 %v262_v24, %s336_s13 }
  0x29   :  { %277 = vrot.lane.b32.xlu0 %v276_v27, %s337_s14 }
  0x7f   :  { %v82_v28 = vpop.permute.xlu0 %81   ;;  %v110_v29 = vpop.permute.xlu1 %109  }
  0x80   :  { %84 = vst.msk [vmem:[#allocation0] sm:$0x7] %vm83_vm3, %v82_v28  }
  0x83   :  { %v96_v30 = vpop.permute.xlu0 %95   ;;  %v124_v31 = vpop.permute.xlu1 %123  }
  0x84   :  { %98 = vst.msk [vmem:[#allocation0] sm:$0x7] %vm97_vm4, %v96_v30  }
  0x85   :  { %112 = vst.msk [vmem:[#allocation0] sm:$0x7] %vm111_vm5, %v110_v29  }
  0x86   :  { %126 = vst.msk [vmem:[#allocation0] sm:$0x7] %vm125_vm6, %v124_v31  }
  0x87   :  { %v138_v32 = vpop.permute.xlu0 %137   ;;  %v152_v33 = vpop.permute.xlu1 %151  }
  0x88   :  { %140 = vst.msk [vmem:[#allocation0] sm:$0x7] %vm139_vm7, %v138_v32  }
  0x89   :  { %154 = vst.msk [vmem:[#allocation0] sm:$0x7] %vm153_vm8, %v152_v33  }
  0x8b   :  { %v166_v34 = vpop.permute.xlu0 %165   ;;  %v180_v35 = vpop.permute.xlu1 %179  }
  0x8c   :  { %168 = vst.msk [vmem:[#allocation0] sm:$0x7] %vm167_vm9, %v166_v34  }
  0x8d   :  { %182 = vst.msk [vmem:[#allocation0] sm:$0x7] %vm181_vm10, %v180_v35  }
  0x8f   :  { %v194_v36 = vpop.permute.xlu0 %193   ;;  %v208_v37 = vpop.permute.xlu1 %207  }
  0x90   :  { %196 = vst.msk [vmem:[#allocation0] sm:$0x7] %vm195_vm11, %v194_v36  }
  0x91   :  { %210 = vst.msk [vmem:[#allocation0] sm:$0x7] %vm209_vm12, %v208_v37  }
  0x93   :  { %v222_v38 = vpop.permute.xlu0 %221   ;;  %v236_v39 = vpop.permute.xlu1 %235  }
  0x94   :  { %224 = vst.msk [vmem:[#allocation0] sm:$0x7] %vm223_vm13, %v222_v38  }
  0x95   :  { %238 = vst.msk [vmem:[#allocation0] sm:$0x7] %vm237_vm14, %v236_v39  }
  0x97   :  { %v250_v40 = vpop.permute.xlu0 %249   ;;  %v264_v41 = vpop.permute.xlu1 %263  }
  0x98   :  { %252 = vst.msk [vmem:[#allocation0] sm:$0x7] %vm251_vm15, %v250_v40  }
  0x99   :  { %266 = vst.msk [vmem:[#allocation0] sm:$0x7] %vm265_vm0, %v264_v41  }
  0x9b   :  { %v278_v42 = vpop.permute.xlu0 %277  }
  0x9c   :  { %280 = vst.msk [vmem:[#allocation0] sm:$0x7] %vm279_vm1, %v278_v42  }
  0xa3   :  { %v284_v43 = vld [vmem:[#allocation0] sm:$0xf] }
  0xa4   :  { %286 = vst [vmem:[%s421_s1] sm:$0xf] %v284_v43 }

// kernel: cross_attention_forward.4
= control target key start
LH: loop header
LB: loop body
LE: loop exit
PB: predicated region body
PF: predicated region fallthrough
CT: control target
= control target key end

     0   :  { %s747_s12 = smov 0   ;;  %s749_s13 = smov 0   ;;  %s878_s0 = inlined_call_operand.vmem [shape: f32[128,32], index: 0, kind: input, shape index: {}]   ;;  %s879_s1 = inlined_call_operand.vmem [shape: bf16[4,32,8], index: 1, kind: input, shape index: {}]   ;;  %s880_s2 = inlined_call_operand.vmem [shape: f32[4,1,8], index: 2, kind: input, shape index: {}]   ;;  %s881_s3 = inlined_call_operand.vmem [shape: bf16[4,128,8], index: 3, kind: output, shape index: {}]  }
   0x1   :  { %s751_s14 = smov 0  }
   0x2 LB: > { %s22_s15 = sadd.s32 1, %s721_s13  ;;  %p591_p0 = scmp.ge.s32.totalorder %s725_s14, 1  ;;  %s725_s14 = sphi %s751_s14, %s13_s14   ;;  %s721_s13 = sphi %s749_s13, %s883_s13   ;;  %s717_s12 = sphi %s747_s12, %s882_s12  }
   0x3   : > { %p23_p1 = scmp.ge.s32.totalorder %s22_s15, 4  ;;  %p170_p2 = scmp.lt.s32.totalorder %s725_s14, 5 }
   0x5   : > { %s885_s15 = smov (%p23_p1, %s22_s15), 0  ;;  %p171_p3 = pnand %p591_p0, %p170_p2 }
   0x6   : > { %p212_p4 = scmp.lt.s32.totalorder (!%p171_p3), %s717_s12, 3  ;;  %v231_v0 = vld [vmem:[%s878_s0] sm:$0xff] (!%p171_p3)  ;;  %v232_v1 = vld [vmem:[%s878_s0 + $0x8] sm:$0xff] (!%p171_p3)  ;;  %vm278_vm0 = vcmask (!%p171_p3), 261120   ;;  %v233_v8 = vld [vmem:[%s878_s0 + $0x10] sm:$0xff] (!%p171_p3)  ;;  %vm464_vm1 = vcmask (!%p171_p3), 60416  }
   0x7   : > { %174 = sbr.rel (%p171_p3) target bundleno = 254 (0xfe), region = 32  ;;  %v239_v2 = vld [vmem:[%s878_s0 + $0x40] sm:$0xff] (!%p171_p3)  ;;  %v247_v3 = vpack.c.bf16 (!%p171_p3), %v232_v1, %v231_v0  ;;  %v240_v4 = vld [vmem:[%s878_s0 + $0x48] sm:$0xff] (!%p171_p3)  ;;  %v234_v9 = vld [vmem:[%s878_s0 + $0x18] sm:$0xff] (!%p171_p3) }
   0x8   : > { %v251_v5 = vpack.c.bf16 (!%p171_p3), %v240_v4, %v239_v2  ;;  %v241_v10 = vld [vmem:[%s878_s0 + $0x50] sm:$0xff] (!%p171_p3)  ;;  %v242_v11 = vld [vmem:[%s878_s0 + $0x58] sm:$0xff] (!%p171_p3)  ;;  %v235_v12 = vld [vmem:[%s878_s0 + $0x20] sm:$0xff] (!%p171_p3)  ;;  %v248_v16 = vpack.c.bf16 (!%p171_p3), %v234_v9, %v233_v8 }
   0x9   : > { %657 = vmatprep.mubr.msk.bf16.mxu0 (!%p171_p3), %vm278_vm0, %v247_v3  ;;  %v236_v13 = vld [vmem:[%s878_s0 + $0x28] sm:$0xff] (!%p171_p3)  ;;  %v243_v14 = vld [vmem:[%s878_s0 + $0x60] sm:$0xff] (!%p171_p3)  ;;  %v252_v17 = vpack.c.bf16 (!%p171_p3), %v242_v11, %v241_v10  ;;  %v237_v20 = vld [vmem:[%s878_s0 + $0x30] sm:$0xff] (!%p171_p3) }
   0xa   : > { %665 = vmatprep.mubr.msk.bf16.mxu1 (!%p171_p3), %vm278_vm0, %v251_v5  ;;  %v244_v15 = vld [vmem:[%s878_s0 + $0x68] sm:$0xff] (!%p171_p3)  ;;  %v249_v18 = vpack.c.bf16 (!%p171_p3), %v236_v13, %v235_v12  ;;  %v238_v21 = vld [vmem:[%s878_s0 + $0x38] sm:$0xff] (!%p171_p3)  ;;  %v245_v22 = vld [vmem:[%s878_s0 + $0x70] sm:$0xff] (!%p171_p3) }
   0xb   : > { %v253_v19 = vpack.c.bf16 (!%p171_p3), %v244_v15, %v243_v14  ;;  %v246_v23 = vld [vmem:[%s878_s0 + $0x78] sm:$0xff] (!%p171_p3)  ;;  %v250_v24 = vpack.c.bf16 (!%p171_p3), %v238_v21, %v237_v20 }
   0xc   : > { %v254_v25 = vpack.c.bf16 (!%p171_p3), %v246_v23, %v245_v22 }
   0xe   : > { %s887_s12 = smov (!%p212_p4, %s717_s12), 3 }
   0xf   : > { %s625_s24 = sshll.u32 %s887_s12, 4  ;;  %s219_s4 = scalar_lea.vmem %s880_s2, %s887_s12 }
  0x10   : > { %s216_s27 = scalar_lea.vmem %s879_s1, %s625_s24  ;;  %v596_v26 = vld [vmem:[%s219_s4] ss:$0 sm:$0xff]  ;;  %s626_s5 = sshll.u32 %s887_s12, 6 }
  0x11   : > { %v701_v6 = vld [vmem:[%s216_s27] sm:$0xff]   ;;  %v702_v7 = vld [vmem:[%s216_s27 + $0x8] sm:$0xff]   ;;  %s835_s8 = scalar_lea.vmem %s881_s3, %s626_s5 }
  0x12   : > { %653 = vmatprep.subr.bf16.mxu0 %v701_v6  ;;  %673 = vmatprep.subr.bf16.mxu1 %v701_v6 }
  0x13   : > { %654 = vmatpush3.bf16.msra.mxu0 %v701_v6  ;;  %675 = vmatpush3.bf16.msra.mxu1 %v701_v6 }
  0x14   : > { %655 = vmatprep.subr.bf16.mxu0 %v702_v7  ;;  %674 = vmatprep.subr.bf16.mxu1 %v702_v7 }
  0x17   : > { %656 = vmatpush3.bf16.msra.mxu0 %v702_v7  ;;  %676 = vmatpush3.bf16.msra.mxu1 %v702_v7 }
  0x1a   : > { %658 = vmatmul.mubr.msk.bf16.vlgmr.msra.gmra.mrb[0].mxu0 %vm278_vm0, %v248_v16  ;;  %666 = vmatmul.mubr.msk.bf16.vlgmr.msra.gmra.mrb[0].mxu1 %vm278_vm0, %v252_v17 }
  0x1b   : > { %661 = vmatprep.mubr.msk.bf16.mxu0 %vm278_vm0, %v249_v18  ;;  %669 = vmatprep.mubr.msk.bf16.mxu1 %vm278_vm0, %v253_v19 }
  0x22   : > { %662 = vmatmul.mubr.msk.bf16.gmra.mrb[4].mxu0 %vm278_vm0, %v250_v24  ;;  %670 = vmatmul.mubr.msk.bf16.gmra.mrb[4].mxu1 %vm278_vm0, %v254_v25 }
  0xed   : > { %v659_v27 = vpop.f32.mrb[0].mxu0  ;;  %v667_v28 = vpop.f32.mrb[0].mxu1 }
  0xee   : > { %v346_v29 = vadd.f32 %v659_v27, %v596_v26  ;;  %v378_v30 = vadd.f32 %v667_v28, %v596_v26  ;;  %v337_v31 = vpop.f32.mrb[1].mxu0  ;;  %v369_v32 = vpop.f32.mrb[1].mxu1 }
  0xef   : > { %v338_v33 = vadd.f32 %v596_v26, %v337_v31  ;;  %v370_v34 = vadd.f32 %v596_v26, %v369_v32  ;;  %v660_v35 = vpop.f32.mrb[2].mxu0  ;;  %v668_v36 = vpop.f32.mrb[2].mxu1 }
  0xf0   : > { %v629_v37 = vpack.c.bf16 %v346_v29, %v346_v29  ;;  %v637_v38 = vpack.c.bf16 %v378_v30, %v378_v30  ;;  %v349_v39 = vadd.f32 %v660_v35, %v596_v26  ;;  %v381_v40 = vadd.f32 %v668_v36, %v596_v26  ;;  %v340_v41 = vpop.f32.mrb[3].mxu0  ;;  %v372_v42 = vpop.f32.mrb[3].mxu1 }
  0xf1   : > { %v627_v43 = vpack.c.bf16 %v338_v33, %v338_v33  ;;  %v635_v44 = vpack.c.bf16 %v370_v34, %v370_v34  ;;  %v341_v45 = vadd.f32 %v596_v26, %v340_v41  ;;  %v373_v46 = vadd.f32 %v596_v26, %v372_v42 }
  0xf2   : > { %467 = vst.msk [vmem:[%s835_s8 + $0x8] sm:$0xf] %vm464_vm1, %v629_v37  ;;  %475 = vst.msk [vmem:[%s835_s8 + $0x28] sm:$0xf] %vm464_vm1, %v637_v38  ;;  %v630_v47 = vpack.c.bf16 %v349_v39, %v349_v39  ;;  %v638_v48 = vpack.c.bf16 %v381_v40, %v381_v40 }
  0xf3   : > { %465 = vst.msk [vmem:[%s835_s8] sm:$0xf] %vm464_vm1, %v627_v43  ;;  %473 = vst.msk [vmem:[%s835_s8 + $0x20] sm:$0xf] %vm464_vm1, %v635_v44  ;;  %v628_v49 = vpack.c.bf16 %v341_v45, %v341_v45  ;;  %v636_v50 = vpack.c.bf16 %v373_v46, %v373_v46 }
  0xf4   : > { %468 = vst.msk [vmem:[%s835_s8 + $0xc] sm:$0xf] %vm464_vm1, %v630_v47  ;;  %476 = vst.msk [vmem:[%s835_s8 + $0x2c] sm:$0xf] %vm464_vm1, %v638_v48 }
  0xf5   : > { %466 = vst.msk [vmem:[%s835_s8 + $0x4] sm:$0xf] %vm464_vm1, %v628_v49  ;;  %474 = vst.msk [vmem:[%s835_s8 + $0x24] sm:$0xf] %vm464_vm1, %v636_v50  ;;  %v663_v51 = vpop.f32.mrb[4].mxu0  ;;  %v671_v52 = vpop.f32.mrb[4].mxu1 }
  0xf6   : > { %v362_v53 = vadd.f32 %v663_v51, %v596_v26  ;;  %v394_v54 = vadd.f32 %v671_v52, %v596_v26  ;;  %v353_v55 = vpop.f32.mrb[5].mxu0  ;;  %v385_v56 = vpop.f32.mrb[5].mxu1 }
  0xf7   : > { %v354_v57 = vadd.f32 %v596_v26, %v353_v55  ;;  %v386_v58 = vadd.f32 %v596_v26, %v385_v56  ;;  %v664_v59 = vpop.f32.mrb[6].mxu0  ;;  %v672_v60 = vpop.f32.mrb[6].mxu1 }
  0xf8   : > { %v633_v61 = vpack.c.bf16 %v362_v53, %v362_v53  ;;  %v641_v62 = vpack.c.bf16 %v394_v54, %v394_v54  ;;  %v365_v63 = vadd.f32 %v664_v59, %v596_v26  ;;  %v397_v0 = vadd.f32 %v672_v60, %v596_v26  ;;  %v356_v1 = vpop.f32.mrb[7].mxu0  ;;  %v388_v2 = vpop.f32.mrb[7].mxu1 }
  0xf9   : > { %v631_v3 = vpack.c.bf16 %v354_v57, %v354_v57  ;;  %v639_v4 = vpack.c.bf16 %v386_v58, %v386_v58  ;;  %v357_v5 = vadd.f32 %v596_v26, %v356_v1  ;;  %v389_v6 = vadd.f32 %v596_v26, %v388_v2 }
  0xfa   : > { %471 = vst.msk [vmem:[%s835_s8 + $0x18] sm:$0xf] %vm464_vm1, %v633_v61  ;;  %479 = vst.msk [vmem:[%s835_s8 + $0x38] sm:$0xf] %vm464_vm1, %v641_v62  ;;  %v634_v7 = vpack.c.bf16 %v365_v63, %v365_v63  ;;  %v642_v8 = vpack.c.bf16 %v397_v0, %v397_v0 }
  0xfb   : > { %469 = vst.msk [vmem:[%s835_s8 + $0x10] sm:$0xf] %vm464_vm1, %v631_v3  ;;  %477 = vst.msk [vmem:[%s835_s8 + $0x30] sm:$0xf] %vm464_vm1, %v639_v4  ;;  %v632_v9 = vpack.c.bf16 %v357_v5, %v357_v5  ;;  %v640_v10 = vpack.c.bf16 %v389_v6, %v389_v6 }
  0xfc   : > { %472 = vst.msk [vmem:[%s835_s8 + $0x1c] sm:$0xf] %vm464_vm1, %v634_v7  ;;  %480 = vst.msk [vmem:[%s835_s8 + $0x3c] sm:$0xf] %vm464_vm1, %v642_v8 }
  0xfd   : > { %470 = vst.msk [vmem:[%s835_s8 + $0x14] sm:$0xf] %vm464_vm1, %v632_v9  ;;  %478 = vst.msk [vmem:[%s835_s8 + $0x34] sm:$0xf] %vm464_vm1, %v640_v10 }
  0xfe PF: > { %s13_s14 = sadd.s32 1, %s725_s14   ;;  %s882_s12 = smov %s721_s13 }
  0xff   : > { %p10_p5 = scmp.ge.s32.totalorder %s13_s14, 6   ;;  %s883_s13 = smov %s885_s15 }
 0x101   :  { %12 = sbr.rel (!%p10_p5) target bundleno = 2 (0x2), region = 68 }

// kernel: cross_attention_forward.5
= control target key start
LH: loop header
LB: loop body
LE: loop exit
PB: predicated region body
PF: predicated region fallthrough
CT: control target
= control target key end

     0   :  { %s747_s12 = smov 0   ;;  %s749_s13 = smov 0   ;;  %s878_s0 = inlined_call_operand.vmem [shape: f32[128,32], index: 0, kind: input, shape index: {}]   ;;  %s879_s1 = inlined_call_operand.vmem [shape: bf16[8,32,8], index: 1, kind: input, shape index: {}]   ;;  %s880_s2 = inlined_call_operand.vmem [shape: f32[8,1,8], index: 2, kind: input, shape index: {}]   ;;  %s881_s3 = inlined_call_operand.vmem [shape: bf16[8,128,8], index: 3, kind: output, shape index: {}]  }
   0x1   :  { %s751_s14 = smov 0  }
   0x2 LB: > { %s22_s15 = sadd.s32 1, %s721_s13  ;;  %p591_p0 = scmp.ge.s32.totalorder %s725_s14, 1  ;;  %s725_s14 = sphi %s751_s14, %s13_s14   ;;  %s721_s13 = sphi %s749_s13, %s883_s13   ;;  %s717_s12 = sphi %s747_s12, %s882_s12  }
   0x3   : > { %p23_p1 = scmp.ge.s32.totalorder %s22_s15, 8  ;;  %p170_p2 = scmp.lt.s32.totalorder %s725_s14, 9 }
   0x5   : > { %s885_s15 = smov (%p23_p1, %s22_s15), 0  ;;  %p171_p3 = pnand %p591_p0, %p170_p2 }
   0x6   : > { %p212_p4 = scmp.lt.s32.totalorder (!%p171_p3), %s717_s12, 7  ;;  %v231_v0 = vld [vmem:[%s878_s0] sm:$0xff] (!%p171_p3)  ;;  %v232_v1 = vld [vmem:[%s878_s0 + $0x8] sm:$0xff] (!%p171_p3)  ;;  %vm278_vm0 = vcmask (!%p171_p3), 261120   ;;  %v233_v8 = vld [vmem:[%s878_s0 + $0x10] sm:$0xff] (!%p171_p3)  ;;  %vm464_vm1 = vcmask (!%p171_p3), 60416  }
   0x7   : > { %174 = sbr.rel (%p171_p3) target bundleno = 254 (0xfe), region = 32  ;;  %v239_v2 = vld [vmem:[%s878_s0 + $0x40] sm:$0xff] (!%p171_p3)  ;;  %v247_v3 = vpack.c.bf16 (!%p171_p3), %v232_v1, %v231_v0  ;;  %v240_v4 = vld [vmem:[%s878_s0 + $0x48] sm:$0xff] (!%p171_p3)  ;;  %v234_v9 = vld [vmem:[%s878_s0 + $0x18] sm:$0xff] (!%p171_p3) }
   0x8   : > { %v251_v5 = vpack.c.bf16 (!%p171_p3), %v240_v4, %v239_v2  ;;  %v241_v10 = vld [vmem:[%s878_s0 + $0x50] sm:$0xff] (!%p171_p3)  ;;  %v242_v11 = vld [vmem:[%s878_s0 + $0x58] sm:$0xff] (!%p171_p3)  ;;  %v235_v12 = vld [vmem:[%s878_s0 + $0x20] sm:$0xff] (!%p171_p3)  ;;  %v248_v16 = vpack.c.bf16 (!%p171_p3), %v234_v9, %v233_v8 }
   0x9   : > { %657 = vmatprep.mubr.msk.bf16.mxu0 (!%p171_p3), %vm278_vm0, %v247_v3  ;;  %v236_v13 = vld [vmem:[%s878_s0 + $0x28] sm:$0xff] (!%p171_p3)  ;;  %v243_v14 = vld [vmem:[%s878_s0 + $0x60] sm:$0xff] (!%p171_p3)  ;;  %v252_v17 = vpack.c.bf16 (!%p171_p3), %v242_v11, %v241_v10  ;;  %v237_v20 = vld [vmem:[%s878_s0 + $0x30] sm:$0xff] (!%p171_p3) }
   0xa   : > { %665 = vmatprep.mubr.msk.bf16.mxu1 (!%p171_p3), %vm278_vm0, %v251_v5  ;;  %v244_v15 = vld [vmem:[%s878_s0 + $0x68] sm:$0xff] (!%p171_p3)  ;;  %v249_v18 = vpack.c.bf16 (!%p171_p3), %v236_v13, %v235_v12  ;;  %v238_v21 = vld [vmem:[%s878_s0 + $0x38] sm:$0xff] (!%p171_p3)  ;;  %v245_v22 = vld [vmem:[%s878_s0 + $0x70] sm:$0xff] (!%p171_p3) }
   0xb   : > { %v253_v19 = vpack.c.bf16 (!%p171_p3), %v244_v15, %v243_v14  ;;  %v246_v23 = vld [vmem:[%s878_s0 + $0x78] sm:$0xff] (!%p171_p3)  ;;  %v250_v24 = vpack.c.bf16 (!%p171_p3), %v238_v21, %v237_v20 }
   0xc   : > { %v254_v25 = vpack.c.bf16 (!%p171_p3), %v246_v23, %v245_v22 }
   0xe   : > { %s887_s12 = smov (!%p212_p4, %s717_s12), 7 }
   0xf   : > { %s625_s24 = sshll.u32 %s887_s12, 4  ;;  %s219_s4 = scalar_lea.vmem %s880_s2, %s887_s12 }
  0x10   : > { %s216_s27 = scalar_lea.vmem %s879_s1, %s625_s24  ;;  %v596_v26 = vld [vmem:[%s219_s4] ss:$0 sm:$0xff]  ;;  %s626_s5 = sshll.u32 %s887_s12, 6 }
  0x11   : > { %v701_v6 = vld [vmem:[%s216_s27] sm:$0xff]   ;;  %v702_v7 = vld [vmem:[%s216_s27 + $0x8] sm:$0xff]   ;;  %s835_s8 = scalar_lea.vmem %s881_s3, %s626_s5 }
  0x12   : > { %653 = vmatprep.subr.bf16.mxu0 %v701_v6  ;;  %673 = vmatprep.subr.bf16.mxu1 %v701_v6 }
  0x13   : > { %654 = vmatpush3.bf16.msra.mxu0 %v701_v6  ;;  %675 = vmatpush3.bf16.msra.mxu1 %v701_v6 }
  0x14   : > { %655 = vmatprep.subr.bf16.mxu0 %v702_v7  ;;  %674 = vmatprep.subr.bf16.mxu1 %v702_v7 }
  0x17   : > { %656 = vmatpush3.bf16.msra.mxu0 %v702_v7  ;;  %676 = vmatpush3.bf16.msra.mxu1 %v702_v7 }
  0x1a   : > { %658 = vmatmul.mubr.msk.bf16.vlgmr.msra.gmra.mrb[0].mxu0 %vm278_vm0, %v248_v16  ;;  %666 = vmatmul.mubr.msk.bf16.vlgmr.msra.gmra.mrb[0].mxu1 %vm278_vm0, %v252_v17 }
  0x1b   : > { %661 = vmatprep.mubr.msk.bf16.mxu0 %vm278_vm0, %v249_v18  ;;  %669 = vmatprep.mubr.msk.bf16.mxu1 %vm278_vm0, %v253_v19 }
  0x22   : > { %662 = vmatmul.mubr.msk.bf16.gmra.mrb[4].mxu0 %vm278_vm0, %v250_v24  ;;  %670 = vmatmul.mubr.msk.bf16.gmra.mrb[4].mxu1 %vm278_vm0, %v254_v25 }
  0xed   : > { %v659_v27 = vpop.f32.mrb[0].mxu0  ;;  %v667_v28 = vpop.f32.mrb[0].mxu1 }
  0xee   : > { %v346_v29 = vadd.f32 %v659_v27, %v596_v26  ;;  %v378_v30 = vadd.f32 %v667_v28, %v596_v26  ;;  %v337_v31 = vpop.f32.mrb[1].mxu0  ;;  %v369_v32 = vpop.f32.mrb[1].mxu1 }
  0xef   : > { %v338_v33 = vadd.f32 %v596_v26, %v337_v31  ;;  %v370_v34 = vadd.f32 %v596_v26, %v369_v32  ;;  %v660_v35 = vpop.f32.mrb[2].mxu0  ;;  %v668_v36 = vpop.f32.mrb[2].mxu1 }
  0xf0   : > { %v629_v37 = vpack.c.bf16 %v346_v29, %v346_v29  ;;  %v637_v38 = vpack.c.bf16 %v378_v30, %v378_v30  ;;  %v349_v39 = vadd.f32 %v660_v35, %v596_v26  ;;  %v381_v40 = vadd.f32 %v668_v36, %v596_v26  ;;  %v340_v41 = vpop.f32.mrb[3].mxu0  ;;  %v372_v42 = vpop.f32.mrb[3].mxu1 }
  0xf1   : > { %v627_v43 = vpack.c.bf16 %v338_v33, %v338_v33  ;;  %v635_v44 = vpack.c.bf16 %v370_v34, %v370_v34  ;;  %v341_v45 = vadd.f32 %v596_v26, %v340_v41  ;;  %v373_v46 = vadd.f32 %v596_v26, %v372_v42 }
  0xf2   : > { %467 = vst.msk [vmem:[%s835_s8 + $0x8] sm:$0xf] %vm464_vm1, %v629_v37  ;;  %475 = vst.msk [vmem:[%s835_s8 + $0x28] sm:$0xf] %vm464_vm1, %v637_v38  ;;  %v630_v47 = vpack.c.bf16 %v349_v39, %v349_v39  ;;  %v638_v48 = vpack.c.bf16 %v381_v40, %v381_v40 }
  0xf3   : > { %465 = vst.msk [vmem:[%s835_s8] sm:$0xf] %vm464_vm1, %v627_v43  ;;  %473 = vst.msk [vmem:[%s835_s8 + $0x20] sm:$0xf] %vm464_vm1, %v635_v44  ;;  %v628_v49 = vpack.c.bf16 %v341_v45, %v341_v45  ;;  %v636_v50 = vpack.c.bf16 %v373_v46, %v373_v46 }
  0xf4   : > { %468 = vst.msk [vmem:[%s835_s8 + $0xc] sm:$0xf] %vm464_vm1, %v630_v47  ;;  %476 = vst.msk [vmem:[%s835_s8 + $0x2c] sm:$0xf] %vm464_vm1, %v638_v48 }
  0xf5   : > { %466 = vst.msk [vmem:[%s835_s8 + $0x4] sm:$0xf] %vm464_vm1, %v628_v49  ;;  %474 = vst.msk [vmem:[%s835_s8 + $0x24] sm:$0xf] %vm464_vm1, %v636_v50  ;;  %v663_v51 = vpop.f32.mrb[4].mxu0  ;;  %v671_v52 = vpop.f32.mrb[4].mxu1 }
  0xf6   : > { %v362_v53 = vadd.f32 %v663_v51, %v596_v26  ;;  %v394_v54 = vadd.f32 %v671_v52, %v596_v26  ;;  %v353_v55 = vpop.f32.mrb[5].mxu0  ;;  %v385_v56 = vpop.f32.mrb[5].mxu1 }
  0xf7   : > { %v354_v57 = vadd.f32 %v596_v26, %v353_v55  ;;  %v386_v58 = vadd.f32 %v596_v26, %v385_v56  ;;  %v664_v59 = vpop.f32.mrb[6].mxu0  ;;  %v672_v60 = vpop.f32.mrb[6].mxu1 }
  0xf8   : > { %v633_v61 = vpack.c.bf16 %v362_v53, %v362_v53  ;;  %v641_v62 = vpack.c.bf16 %v394_v54, %v394_v54  ;;  %v365_v63 = vadd.f32 %v664_v59, %v596_v26  ;;  %v397_v0 = vadd.f32 %v672_v60, %v596_v26  ;;  %v356_v1 = vpop.f32.mrb[7].mxu0  ;;  %v388_v2 = vpop.f32.mrb[7].mxu1 }
  0xf9   : > { %v631_v3 = vpack.c.bf16 %v354_v57, %v354_v57  ;;  %v639_v4 = vpack.c.bf16 %v386_v58, %v386_v58  ;;  %v357_v5 = vadd.f32 %v596_v26, %v356_v1  ;;  %v389_v6 = vadd.f32 %v596_v26, %v388_v2 }
  0xfa   : > { %471 = vst.msk [vmem:[%s835_s8 + $0x18] sm:$0xf] %vm464_vm1, %v633_v61  ;;  %479 = vst.msk [vmem:[%s835_s8 + $0x38] sm:$0xf] %vm464_vm1, %v641_v62  ;;  %v634_v7 = vpack.c.bf16 %v365_v63, %v365_v63  ;;  %v642_v8 = vpack.c.bf16 %v397_v0, %v397_v0 }
  0xfb   : > { %469 = vst.msk [vmem:[%s835_s8 + $0x10] sm:$0xf] %vm464_vm1, %v631_v3  ;;  %477 = vst.msk [vmem:[%s835_s8 + $0x30] sm:$0xf] %vm464_vm1, %v639_v4  ;;  %v632_v9 = vpack.c.bf16 %v357_v5, %v357_v5  ;;  %v640_v10 = vpack.c.bf16 %v389_v6, %v389_v6 }
  0xfc   : > { %472 = vst.msk [vmem:[%s835_s8 + $0x1c] sm:$0xf] %vm464_vm1, %v634_v7  ;;  %480 = vst.msk [vmem:[%s835_s8 + $0x3c] sm:$0xf] %vm464_vm1, %v642_v8 }
  0xfd   : > { %470 = vst.msk [vmem:[%s835_s8 + $0x14] sm:$0xf] %vm464_vm1, %v632_v9  ;;  %478 = vst.msk [vmem:[%s835_s8 + $0x34] sm:$0xf] %vm464_vm1, %v640_v10 }
  0xfe PF: > { %s13_s14 = sadd.s32 1, %s725_s14   ;;  %s882_s12 = smov %s721_s13 }
  0xff   : > { %p10_p5 = scmp.ge.s32.totalorder %s13_s14, 10   ;;  %s883_s13 = smov %s885_s15 }
 0x101   :  { %12 = sbr.rel (!%p10_p5) target bundleno = 2 (0x2), region = 68 }

// kernel: cross_attention_forward.6
= control target key start
LH: loop header
LB: loop body
LE: loop exit
PB: predicated region body
PF: predicated region fallthrough
CT: control target
= control target key end

     0   :  { %s1238_s15 = smov 0   ;;  %s1240_s16 = smov 0   ;;  %s1377_s0 = inlined_call_operand.vmem [shape: bf16[4,2,64,8], index: 0, kind: input, shape index: {}]   ;;  %s1378_s1 = inlined_call_operand.vmem [shape: bf16[8,2,64,8], index: 1, kind: input, shape index: {}, may-alias: {1,2}]   ;;  %s1379_s2 = inlined_call_operand.vmem [shape: bf16[8,2,64,8], index: 2, kind: input, shape index: {}, may-alias: {1,2}]   ;;  %s1380_s3 = inlined_call_operand.vmem [shape: bf16[4,64,64], index: 3, kind: input, shape index: {}]   ;;  %s1381_s4 = inlined_call_operand.vmem [shape: bf16[4,2,64,8], index: 4, kind: output, shape index: {}]  }
   0x1   :  { %s1242_s17 = smov 0   ;;  %s1244_s18 = smov 0  }
   0x2   :  { %s1246_s19 = smov 0  }
   0x3 LB: > { %s29_s20 = sadd.s32 1, %s1203_s17  ;;  %s33_s21 = sadd.s32 1, %s1207_s18  ;;  %s1211_s19 = sphi %s1246_s19, %s14_s19   ;;  %s1207_s18 = sphi %s1244_s18, %s1385_s18   ;;  %s1203_s17 = sphi %s1242_s17, %s1384_s17   ;;  %s1199_s16 = sphi %s1240_s16, %s1383_s16   ;;  %s1195_s15 = sphi %s1238_s15, %s1382_s15  }
   0x4   : > { %p31_p0 = scmp.ge.s32.totalorder %s29_s20, 4  ;;  %p964_p1 = scmp.ge.s32.totalorder %s1211_s19, 1 }
   0x5   : > { %p251_p2 = scmp.lt.s32.totalorder %s1211_s19, 9 }
   0x6   : > { %s1387_s20 = smov (%p31_p0, %s29_s20), 0  ;;  %s1389_s21 = smov (!%p31_p0, %s33_s21), %s1207_s18 }
   0x7   : > { %p252_p3 = pnand %p964_p1, %p251_p2  ;;  %p35_p4 = scmp.ge.s32.totalorder %s1389_s21, 2 }
   0x8   : > { %p324_p5 = scmp.lt.s32.totalorder (!%p252_p3), %s1199_s16, 1  ;;  %p335_p6 = scmp.lt.s32.totalorder (!%p252_p3), %s1195_s15, 7  ;;  %vm452_vm0 = vcmask (!%p252_p3), 64512   ;;  %vm542_vm1 = vcmask (!%p252_p3), 523264   ;;  %vm776_vm2 = vcmask (!%p252_p3), 60416  }
   0x9   : > { %s1391_s21 = smov (%p35_p4, %s1389_s21), 0  ;;  %255 = sbr.rel (%p252_p3) target bundleno = 821 (0x335), region = 36 }
   0xa   : > { %p322_p7 = scmp.lt.s32.totalorder (!%p252_p3), %s1195_s15, 3 }
  0x10   : > { %s1393_s16 = smov (!%p324_p5, %s1199_s16), 1 }
  0x11   : > { %s336_s22 = scalar_select %p335_p6, %s1195_s15, 7 }
  0x12   : > { %s1272_s23 = sshll.u32 %s1393_s16, 3  ;;  %s344_s16 = sadd.s32 4, %s1195_s15 }
  0x13   : > { %s969_s24 = sshll.u32 %s336_s22, 4  ;;  %p345_p8 = scmp.lt.s32.totalorder %s344_s16, 7 }
  0x14   : > { %s341_s25 = sadd.s32 %s969_s24, %s1272_s23 }
  0x15   : > { %s970_s26 = sshll.u32 %s341_s25, 2  ;;  %s1395_s16 = smov (!%p345_p8, %s344_s16), 7 }
  0x16   : > { %s343_s29 = scalar_lea.vmem %s1378_s1, %s970_s26  ;;  %s972_s22 = sshll.u32 %s1395_s16, 4 }
  0x17   : > { %v1129_v0 = vld [vmem:[%s343_s29] sm:$0xff]   ;;  %s1280_s30 = scalar_select %p322_p7, %s1195_s15, 3  ;;  %v1130_v1 = vld [vmem:[%s343_s29 + $0x8] sm:$0xff]   ;;  %v1131_v3 = vld [vmem:[%s343_s29 + $0x10] sm:$0xff]  }
  0x18   : > { %1085 = vmatprep.subr.msk.bf16.mxu0 %vm452_vm0, %v1129_v0  ;;  %v466_v2 = vsel %vm452_vm0, %v1129_v0, 0  ;;  %v469_v4 = vsel %vm452_vm0, %v1130_v1, 0  ;;  %v472_v6 = vsel %vm452_vm0, %v1131_v3, 0  ;;  %v1132_v7 = vld [vmem:[%s343_s29 + $0x18] sm:$0xff]   ;;  %s351_s24 = sadd.s32 %s972_s22, %s1272_s23 }
  0x19   : > { %1054 = vmatpush3.bf16.xpose.msra.mxu0 %v466_v2  ;;  %s966_s5 = sshll.u32 %s1280_s30, 4  ;;  %v475_v8 = vsel %vm452_vm0, %v1132_v7, 0  ;;  %s1009_s11 = sshll.u32 %s1280_s30, 5 }
  0x1a   : > { %1086 = vmatprep.subr.msk.bf16.mxu0 %vm452_vm0, %v1130_v1  ;;  %s1287_s6 = sadd.s32 %s966_s5, %s1272_s23  ;;  %s363_s14 = scalar_lea.vmem %s1380_s3, %s1009_s11 }
  0x1b   : > { %s967_s7 = sshll.u32 %s1287_s6, 2  ;;  %v1034_v12 = vld [vmem:[%s363_s14 + $0x8] sm:$0xff]   ;;  %v1019_v13 = vld [vmem:[%s363_s14] sm:$0xff]   ;;  %v1036_v23 = vld [vmem:[%s363_s14 + $0x18] sm:$0xff]   ;;  %s973_s25 = sshll.u32 %s351_s24, 2 }
  0x1c   : > { %s333_s10 = scalar_lea.vmem %s1377_s0, %s967_s7  ;;  %v1024_v14 = vunpack.c.l.bf16 %v1034_v12  ;;  %v1020_v15 = vunpack.c.l.bf16 %v1019_v13  ;;  %v1025_v16 = vunpack.c.h.bf16 %v1034_v12  ;;  %v1021_v18 = vunpack.c.h.bf16 %v1019_v13  ;;  %v1035_v27 = vld [vmem:[%s363_s14 + $0x10] sm:$0xff]   ;;  %s353_s28 = scalar_lea.vmem %s1379_s2, %s973_s25 }
  0x1d   : > { %v1133_v5 = vld [vmem:[%s333_s10] sm:$0xff]   ;;  %v1134_v9 = vld [vmem:[%s333_s10 + $0x8] sm:$0xff]   ;;  %v1135_v10 = vld [vmem:[%s333_s10 + $0x10] sm:$0xff]   ;;  %v1032_v30 = vunpack.c.l.bf16 %v1036_v23  ;;  %v1028_v31 = vunpack.c.l.bf16 %v1035_v27  ;;  %v1033_v33 = vunpack.c.h.bf16 %v1036_v23  ;;  %v1029_v36 = vunpack.c.h.bf16 %v1035_v27  ;;  %s377_s29 = scalar_lea.vmem %s1381_s4, %s967_s7 }
  0x1e   : > { %1061 = vmatprep.mubr.msk.bf16.mxu0 %vm452_vm0, %v1133_v5  ;;  %v1136_v11 = vld [vmem:[%s333_s10 + $0x18] sm:$0xff]  }
  0x1f   : > { %v1140_v27 = vld [vmem:[%s353_s28 + $0x18] sm:$0xff]  }
  0x21   : > { %1056 = vmatpush3.bf16.xpose.msra.mxu0 %v469_v4 }
  0x22   : > { %1087 = vmatprep.subr.msk.bf16.mxu0 %vm452_vm0, %v1131_v3 }
  0x29   : > { %1058 = vmatpush3.bf16.xpose.msra.mxu0 %v472_v6 }
  0x2a   : > { %1088 = vmatprep.subr.msk.bf16.mxu0 %vm452_vm0, %v1132_v7 }
  0x31   : > { %1060 = vmatpush3.bf16.xpose.msra.mxu0 %v475_v8 }
  0x38   : > { %1062 = vmatmul.mubr.msk.bf16.vlgmr.msra.gmra.mrb[0].mxu0 %vm452_vm0, %v1134_v9 }
  0x39   : > { %1065 = vmatprep.mubr.msk.bf16.mxu0 %vm452_vm0, %v1135_v10 }
  0x40   : > { %1066 = vmatmul.mubr.msk.bf16.gmra.mrb[4].mxu0 %vm452_vm0, %v1136_v11 }
 0x10b   : > { %v1063_v17 = vpop.f32.mrb[0].mxu0 }
 0x10c   : > { %v520_v19 = vadd.f32 %v1063_v17, %v1024_v14  ;;  %v511_v20 = vpop.f32.mrb[1].mxu0 }
 0x10d   : > { %v512_v21 = vadd.f32 %v1020_v15, %v511_v20  ;;  %v1064_v22 = vpop.f32.mrb[2].mxu0 }
 0x10e   : > { %v523_v24 = vadd.f32 %v1064_v22, %v1025_v16  ;;  %v514_v25 = vpop.f32.mrb[3].mxu0  ;;  %v549_v26 = vsel %vm542_vm1, %v520_v19, -inf }
 0x10f   : > { %v515_v28 = vadd.f32 %v1021_v18, %v514_v25  ;;  %550 = vmax.xlane.f32.xlu1 %v549_v26  ;;  %v543_v29 = vsel %vm542_vm1, %v512_v21, -inf  ;;  %v1138_v25 = vld [vmem:[%s353_s28 + $0x8] sm:$0xff]   ;;  %v1139_v26 = vld [vmem:[%s353_s28 + $0x10] sm:$0xff]  }
 0x110   : > { %544 = vmax.xlane.f32.xlu0 %v543_v29  ;;  %v552_v32 = vsel %vm542_vm1, %v523_v24, -inf }
 0x111   : > { %v546_v35 = vsel %vm542_vm1, %v515_v28, -inf }
 0x113   : > { %553 = vmax.xlane.f32.xlu1 %v552_v32  ;;  %v1067_v34 = vpop.f32.mrb[4].mxu0 }
 0x114   : > { %v536_v37 = vadd.f32 %v1067_v34, %v1032_v30  ;;  %v527_v38 = vpop.f32.mrb[5].mxu0  ;;  %547 = vmax.xlane.f32.xlu0 %v546_v35 }
 0x115   : > { %v528_v39 = vadd.f32 %v1028_v31, %v527_v38  ;;  %v1068_v40 = vpop.f32.mrb[6].mxu0 }
 0x116   : > { %v539_v41 = vadd.f32 %v1068_v40, %v1033_v33  ;;  %v530_v42 = vpop.f32.mrb[7].mxu0  ;;  %v561_v46 = vsel %vm542_vm1, %v536_v37, -inf }
 0x117   : > { %v531_v43 = vadd.f32 %v1029_v36, %v530_v42  ;;  %v555_v44 = vsel %vm542_vm1, %v528_v39, -inf }
 0x118   : > { %556 = vmax.xlane.f32.xlu0 %v555_v44  ;;  %v564_v47 = vsel %vm542_vm1, %v539_v41, -inf }
 0x119   : > { %v558_v45 = vsel %vm542_vm1, %v531_v43, -inf }
 0x11a   : > { %559 = vmax.xlane.f32.xlu1 %v558_v45 }
 0x11c   : > { %562 = vmax.xlane.f32.xlu0 %v561_v46 }
 0x11e   : > { %565 = vmax.xlane.f32.xlu1 %v564_v47 }
 0x19c   : > { %v551_v48 = vpop.xlane.xlu1 %550 }
 0x19d   : > { %v569_v49 = vsub.f32 %v520_v19, %v551_v48  ;;  %v545_v50 = vpop.xlane.xlu0 %544 }
 0x19e   : > { %v567_v51 = vsub.f32 %v512_v21, %v545_v50 }
 0x19f   : > { %v579_v52 = vmul.f32 1.442695, %v569_v49 }
 0x1a0   : > { %v575_v53 = vmul.f32 1.442695, %v567_v51  ;;  %v554_v54 = vpop.xlane.xlu1 %553 }
 0x1a1   : > { %v570_v55 = vsub.f32 %v523_v24, %v554_v54  ;;  %v548_v56 = vpop.xlane.xlu0 %547  ;;  %v1137_v24 = vld [vmem:[%s353_s28] sm:$0xff]  }
 0x1a2   : > { %1141 = vpow2.f32 %v575_v53  ;;  %v568_v57 = vsub.f32 %v515_v28, %v548_v56  ;;  %1069 = vmatprep.subr.bf16.mxu1 %v1137_v24 }
 0x1a3   : > { %1143 = vpow2.f32 %v579_v52  ;;  %v581_v58 = vmul.f32 1.442695, %v570_v55  ;;  %1070 = vmatpush3.bf16.msra.mxu1 %v1137_v24 }
 0x1a4   : > { %v577_v59 = vmul.f32 1.442695, %v568_v57  ;;  %1071 = vmatprep.subr.bf16.mxu1 %v1138_v25 }
 0x1a5   : > { %v557_v60 = vpop.xlane.xlu0 %556 }
 0x1a6   : > { %1145 = vpow2.f32 %v577_v59  ;;  %v571_v61 = vsub.f32 %v528_v39, %v557_v60 }
 0x1a7   : > { %v560_v62 = vpop.xlane.xlu1 %559  ;;  %1147 = vpow2.f32 %v581_v58  ;;  %1072 = vmatpush3.bf16.msra.mxu1 %v1138_v25 }
 0x1a8   : > { %v583_v63 = vmul.f32 1.442695, %v571_v61  ;;  %v572_v0 = vsub.f32 %v531_v43, %v560_v62  ;;  %1073 = vmatprep.subr.bf16.mxu1 %v1139_v26 }
 0x1a9   : > { %v563_v1 = vpop.xlane.xlu0 %562 }
 0x1aa   : > { %1149 = vpow2.f32 %v583_v63  ;;  %v585_v2 = vmul.f32 1.442695, %v572_v0  ;;  %v573_v3 = vsub.f32 %v536_v37, %v563_v1 }
 0x1ab   : > { %v566_v4 = vpop.xlane.xlu1 %565  ;;  %1074 = vmatpush3.bf16.msra.mxu1 %v1139_v26 }
 0x1ac   : > { %v1316_v5 = vpop.eup %1141  ;;  %1151 = vpow2.f32 %v585_v2  ;;  %v587_v6 = vmul.f32 1.442695, %v573_v3  ;;  %v574_v7 = vsub.f32 %v539_v41, %v566_v4  ;;  %1075 = vmatprep.subr.bf16.mxu1 %v1140_v27 }
 0x1ad   : > { %v591_v8 = vsel %vm542_vm1, %v1316_v5, 0.0  ;;  %v1320_v9 = vpop.eup %1143 }
 0x1ae   : > { %1153 = vpow2.f32 %v587_v6  ;;  %v589_v10 = vmul.f32 1.442695, %v574_v7  ;;  %592 = vadd.xlane.f32.xlu0 %v591_v8  ;;  %v597_v12 = vsel %vm542_vm1, %v1320_v9, 0.0 }
 0x1af   : > { %1076 = vmatpush3.bf16.msra.mxu1 %v1140_v27 }
 0x1b0   : > { %v1146_v11 = vpop.eup %1145  ;;  %1155 = vpow2.f32 %v589_v10 }
 0x1b1   : > { %v594_v13 = vsel %vm542_vm1, %v1146_v11, 0.0  ;;  %v1148_v14 = vpop.eup %1147 }
 0x1b2   : > { %598 = vadd.xlane.f32.xlu0 %v597_v12  ;;  %595 = vadd.xlane.f32.xlu1 %v594_v13  ;;  %v600_v16 = vsel %vm542_vm1, %v1148_v14, 0.0 }
 0x1b4   : > { %v1325_v15 = vpop.eup %1149 }
 0x1b5   : > { %v603_v17 = vsel %vm542_vm1, %v1325_v15, 0.0 }
 0x1b6   : > { %v1152_v18 = vpop.eup %1151  ;;  %601 = vadd.xlane.f32.xlu1 %v600_v16  ;;  %604 = vadd.xlane.f32.xlu0 %v603_v17 }
 0x1b7   : > { %v606_v20 = vsel %vm542_vm1, %v1152_v18, 0.0 }
 0x1b8   : > { %v1330_v19 = vpop.eup %1153 }
 0x1b9   : > { %v609_v21 = vsel %vm542_vm1, %v1330_v19, 0.0 }
 0x1ba   : > { %v1156_v22 = vpop.eup %1155  ;;  %607 = vadd.xlane.f32.xlu1 %v606_v20  ;;  %610 = vadd.xlane.f32.xlu0 %v609_v21 }
 0x1bb   : > { %v612_v23 = vsel %vm542_vm1, %v1156_v22, 0.0 }
 0x1be   : > { %613 = vadd.xlane.f32.xlu1 %v612_v23 }
 0x23b   : > { %v593_v28 = vpop.xlane.xlu0 %592 }
 0x23c   : > { %1157 = vrcp.f32 %v593_v28 }
 0x23f   : > { %v596_v29 = vpop.xlane.xlu1 %595  ;;  %v599_v30 = vpop.xlane.xlu0 %598 }
 0x240   : > { %1159 = vrcp.f32 %v596_v29 }
 0x241   : > { %1161 = vrcp.f32 %v599_v30 }
 0x243   : > { %v602_v31 = vpop.xlane.xlu1 %601  ;;  %v605_v32 = vpop.xlane.xlu0 %604 }
 0x244   : > { %1163 = vrcp.f32 %v602_v31 }
 0x245   : > { %1165 = vrcp.f32 %v605_v32 }
 0x246   : > { %v1158_v35 = vpop.eup %1157 }
 0x247   : > { %v608_v33 = vpop.xlane.xlu1 %607  ;;  %v611_v34 = vpop.xlane.xlu0 %610  ;;  %v623_v38 = vmul.f32 %v1158_v35, %v1316_v5 }
 0x248   : > { %1167 = vrcp.f32 %v608_v33 }
 0x249   : > { %1169 = vrcp.f32 %v611_v34 }
 0x24a   : > { %v1160_v36 = vpop.eup %1159 }
 0x24b   : > { %v614_v37 = vpop.xlane.xlu1 %613  ;;  %v624_v39 = vmul.f32 %v1160_v36, %v1146_v11  ;;  %v1162_v40 = vpop.eup %1161 }
 0x24c   : > { %1171 = vrcp.f32 %v614_v37  ;;  %v625_v43 = vmul.f32 %v1162_v40, %v1320_v9 }
 0x24d   : > { %v631_v41 = vpack.c.bf16 %v624_v39, %v623_v38 }
 0x24e   : > { %v1164_v42 = vpop.eup %1163 }
 0x24f   : > { %1077 = vmatprep.mubr.msk.bf16.mxu1 %vm542_vm1, %v631_v41  ;;  %v626_v44 = vmul.f32 %v1164_v42, %v1148_v14  ;;  %v1166_v45 = vpop.eup %1165 }
 0x250   : > { %v627_v48 = vmul.f32 %v1166_v45, %v1325_v15 }
 0x251   : > { %v632_v46 = vpack.c.bf16 %v626_v44, %v625_v43 }
 0x252   : > { %v1168_v47 = vpop.eup %1167 }
 0x253   : > { %1078 = vmatmul.mubr.msk.bf16.vlgmr.msra.gmra.mrb[0].mxu1 %vm542_vm1, %v632_v46  ;;  %v628_v49 = vmul.f32 %v1168_v47, %v1152_v18  ;;  %v1170_v50 = vpop.eup %1169 }
 0x254   : > { %v629_v53 = vmul.f32 %v1170_v50, %v1330_v19 }
 0x255   : > { %v633_v51 = vpack.c.bf16 %v628_v49, %v627_v48 }
 0x256   : > { %v1172_v52 = vpop.eup %1171 }
 0x257   : > { %1081 = vmatprep.mubr.msk.bf16.mxu1 %vm542_vm1, %v633_v51  ;;  %v630_v54 = vmul.f32 %v1172_v52, %v1156_v22 }
 0x259   : > { %v634_v55 = vpack.c.bf16 %v630_v54, %v629_v53 }
 0x25b   : > { %1082 = vmatmul.mubr.msk.bf16.gmra.mrb[4].mxu1 %vm542_vm1, %v634_v55 }
 0x326   : > { %v1079_v56 = vpop.f32.mrb[0].mxu1 }
 0x327   : > { %v1012_v57 = vpack.c.bf16 %v1079_v56, %v1079_v56  ;;  %v713_v58 = vpop.f32.mrb[1].mxu1 }
 0x328   : > { %v1010_v59 = vpack.c.bf16 %v713_v58, %v713_v58  ;;  %v1080_v60 = vpop.f32.mrb[2].mxu1 }
 0x329   : > { %779 = vst.msk [vmem:[%s377_s29 + $0x8] sm:$0xf] %vm776_vm2, %v1012_v57  ;;  %v1013_v61 = vpack.c.bf16 %v1080_v60, %v1080_v60  ;;  %v716_v62 = vpop.f32.mrb[3].mxu1 }
 0x32a   : > { %777 = vst.msk [vmem:[%s377_s29] sm:$0xf] %vm776_vm2, %v1010_v59  ;;  %v1011_v63 = vpack.c.bf16 %v716_v62, %v716_v62 }
 0x32b   : > { %780 = vst.msk [vmem:[%s377_s29 + $0xc] sm:$0xf] %vm776_vm2, %v1013_v61 }
 0x32c   : > { %778 = vst.msk [vmem:[%s377_s29 + $0x4] sm:$0xf] %vm776_vm2, %v1011_v63 }
 0x32e   : > { %v1083_v0 = vpop.f32.mrb[4].mxu1 }
 0x32f   : > { %v1016_v1 = vpack.c.bf16 %v1083_v0, %v1083_v0  ;;  %v729_v2 = vpop.f32.mrb[5].mxu1 }
 0x330   : > { %v1014_v3 = vpack.c.bf16 %v729_v2, %v729_v2  ;;  %v1084_v4 = vpop.f32.mrb[6].mxu1 }
 0x331   : > { %783 = vst.msk [vmem:[%s377_s29 + $0x18] sm:$0xf] %vm776_vm2, %v1016_v1  ;;  %v1017_v5 = vpack.c.bf16 %v1084_v4, %v1084_v4  ;;  %v732_v6 = vpop.f32.mrb[7].mxu1 }
 0x332   : > { %781 = vst.msk [vmem:[%s377_s29 + $0x10] sm:$0xf] %vm776_vm2, %v1014_v3  ;;  %v1015_v7 = vpack.c.bf16 %v732_v6, %v732_v6 }
 0x333   : > { %784 = vst.msk [vmem:[%s377_s29 + $0x1c] sm:$0xf] %vm776_vm2, %v1017_v5 }
 0x334   : > { %782 = vst.msk [vmem:[%s377_s29 + $0x14] sm:$0xf] %vm776_vm2, %v1015_v7 }
 0x335 PF: > { %s14_s19 = sadd.s32 1, %s1211_s19   ;;  %s1382_s15 = smov %s1203_s17 }
 0x336   : > { %p11_p9 = scmp.ge.s32.totalorder %s14_s19, 10   ;;  %s1383_s16 = smov %s1207_s18 }
 0x337   : > { %s1384_s17 = smov %s1387_s20  ;;  %s1385_s18 = smov %s1391_s21 }
 0x338   :  { %13 = sbr.rel (!%p11_p9) target bundleno = 3 (0x3), region = 75 }

// kernel: cross_attention_forward.7
= control target key start
LH: loop header
LB: loop body
LE: loop exit
PB: predicated region body
PF: predicated region fallthrough
CT: control target
= control target key end

     0   :  { %s695_s12 = smov 0   ;;  %s697_s13 = smov 0   ;;  %s925_s0 = inlined_call_operand.vmem [shape: bf16[4,128,8], index: 0, kind: input, shape index: {}]   ;;  %s926_s1 = inlined_call_operand.vmem [shape: bf16[4,8,32], index: 1, kind: input, shape index: {}]   ;;  %s927_s2 = inlined_call_operand.vmem [shape: f32[1,32], index: 2, kind: input, shape index: {}]   ;;  %s928_s3 = inlined_call_operand.vmem [shape: f32[128,32], index: 3, kind: output, shape index: {}]  }
   0x1   :  { %s699_s14 = smov 0  }
   0x2 LB: > { %s22_s15 = sadd.s32 1, %s669_s13  ;;  %p561_p0 = scmp.ge.s32.totalorder %s673_s14, 1  ;;  %s673_s14 = sphi %s699_s14, %s13_s14   ;;  %s669_s13 = sphi %s697_s13, %s930_s13   ;;  %s665_s12 = sphi %s695_s12, %s929_s12  }
   0x3   : > { %p23_p1 = scmp.ge.s32.totalorder %s22_s15, 4  ;;  %p165_p2 = scmp.lt.s32.totalorder %s673_s14, 5 }
   0x5   : > { %s932_s15 = smov (%p23_p1, %s22_s15), 0  ;;  %p166_p3 = pnand %p561_p0, %p165_p2 }
   0x6   : > { %p198_p4 = scmp.lt.s32.totalorder (!%p166_p3), %s665_s12, 3  ;;  %p565_p5 = scmp.ne.s32.totalorder (!%p166_p3), %s665_s12, 0 }
   0x7   : > { %169 = sbr.rel (%p166_p3) target bundleno = 255 (0xff), region = 32 }
   0xe   : > { %s199_s16 = scalar_select %p198_p4, %s665_s12, 3 }
   0xf   : > { %221 = sbr.rel (%p565_p5) target bundleno = 24 (0x18), region = 36  ;;  %v566_v0 = vld [vmem:[%s927_s2] ss:$0 sm:$0xff] (!%p565_p5)  ;;  %vm229_vm0 = vcmask (!%p565_p5), 261120  }
  0x10   : > { %s587_s17 = sshll.u32 %s199_s16, 6  ;;  %s564_s18 = sshll.u32 %s199_s16, 2  ;;  %230 = vst.msk [vmem:[%s928_s3] sm:$0xff] (!%p565_p5), %vm229_vm0, %v566_v0  ;;  %231 = vst.msk [vmem:[%s928_s3 + $0x8] sm:$0xff] (!%p565_p5), %vm229_vm0, %v566_v0 }
  0x11   : > { %s716_s21 = scalar_lea.vmem %s925_s0, %s587_s17  ;;  %s210_s24 = scalar_lea.vmem %s926_s1, %s564_s18  ;;  %232 = vst.msk [vmem:[%s928_s3 + $0x10] sm:$0xff] (!%p565_p5), %vm229_vm0, %v566_v0  ;;  %233 = vst.msk [vmem:[%s928_s3 + $0x18] sm:$0xff] (!%p565_p5), %vm229_vm0, %v566_v0 }
  0x12   : > { %234 = vst.msk [vmem:[%s928_s3 + $0x20] sm:$0xff] (!%p565_p5), %vm229_vm0, %v566_v0  ;;  %235 = vst.msk [vmem:[%s928_s3 + $0x28] sm:$0xff] (!%p565_p5), %vm229_vm0, %v566_v0 }
  0x13   : > { %236 = vst.msk [vmem:[%s928_s3 + $0x30] sm:$0xff] (!%p565_p5), %vm229_vm0, %v566_v0  ;;  %237 = vst.msk [vmem:[%s928_s3 + $0x38] sm:$0xff] (!%p565_p5), %vm229_vm0, %v566_v0 }
  0x14   : > { %238 = vst.msk [vmem:[%s928_s3 + $0x40] sm:$0xff] (!%p565_p5), %vm229_vm0, %v566_v0  ;;  %239 = vst.msk [vmem:[%s928_s3 + $0x48] sm:$0xff] (!%p565_p5), %vm229_vm0, %v566_v0 }
  0x15   : > { %240 = vst.msk [vmem:[%s928_s3 + $0x50] sm:$0xff] (!%p565_p5), %vm229_vm0, %v566_v0  ;;  %241 = vst.msk [vmem:[%s928_s3 + $0x58] sm:$0xff] (!%p565_p5), %vm229_vm0, %v566_v0 }
  0x16   : > { %242 = vst.msk [vmem:[%s928_s3 + $0x60] sm:$0xff] %vm229_vm0, %v566_v0  ;;  %243 = vst.msk [vmem:[%s928_s3 + $0x68] sm:$0xff] %vm229_vm0, %v566_v0 }
  0x17   : > { %244 = vst.msk [vmem:[%s928_s3 + $0x70] sm:$0xff] %vm229_vm0, %v566_v0  ;;  %245 = vst.msk [vmem:[%s928_s3 + $0x78] sm:$0xff] %vm229_vm0, %v566_v0 }
  0x18 PF: > { %v278_v1 = vld [vmem:[%s210_s24] sm:$0xf]  ;;  %vm344_vm1 = vcmask 1043456   ;;  %vm319_vm2 = vcmask 64512   ;;  %v645_v5 = vld [vmem:[%s716_s21 + $0x8] sm:$0xff]   ;;  %v647_v7 = vld [vmem:[%s716_s21 + $0x10] sm:$0xff]  }
  0x19   : > { %v643_v2 = vld [vmem:[%s716_s21] sm:$0xff]   ;;  %617 = vmatprep.subr.msk.bf16.mxu0 %vm344_vm1, %v278_v1  ;;  %618 = vmatprep.subr.msk.bf16.mxu1 %vm344_vm1, %v278_v1  ;;  %v346_v3 = vsel %vm344_vm1, %v278_v1, 0  ;;  %v646_v6 = vld [vmem:[%s716_s21 + $0x28] sm:$0xff]   ;;  %v648_v8 = vld [vmem:[%s716_s21 + $0x30] sm:$0xff]   ;;  %vm461_vm3 = vcmask 261120  }
  0x1a   : > { %598 = vmatpush3.bf16.msra.mxu0 %v346_v3  ;;  %616 = vmatpush3.bf16.msra.mxu1 %v346_v3  ;;  %v644_v4 = vld [vmem:[%s716_s21 + $0x20] sm:$0xff]   ;;  %v649_v9 = vld [vmem:[%s716_s21 + $0x18] sm:$0xff]   ;;  %v248_v11 = vld [vmem:[%s928_s3 + $0x10] sm:$0xff] }
  0x1b   : > { %599 = vmatprep.mubr.msk.bf16.mxu0 %vm319_vm2, %v643_v2  ;;  %607 = vmatprep.mubr.msk.bf16.mxu1 %vm319_vm2, %v644_v4  ;;  %v650_v10 = vld [vmem:[%s716_s21 + $0x38] sm:$0xff]   ;;  %v246_v13 = vld [vmem:[%s928_s3] sm:$0xff]  ;;  %v247_v21 = vld [vmem:[%s928_s3 + $0x8] sm:$0xff] }
  0x1c   : > { %v249_v16 = vld [vmem:[%s928_s3 + $0x18] sm:$0xff]  ;;  %v252_v35 = vld [vmem:[%s928_s3 + $0x30] sm:$0xff]  ;;  %v250_v37 = vld [vmem:[%s928_s3 + $0x20] sm:$0xff] }
  0x1d   : > { %600 = vmatmul.mubr.msk.bf16.vlgmr.msra.gmra.mrb[0].mxu0 %vm319_vm2, %v645_v5  ;;  %608 = vmatmul.mubr.msk.bf16.vlgmr.msra.gmra.mrb[0].mxu1 %vm319_vm2, %v646_v6  ;;  %v254_v15 = vld [vmem:[%s928_s3 + $0x40] sm:$0xff]  ;;  %v255_v26 = vld [vmem:[%s928_s3 + $0x48] sm:$0xff]  ;;  %v253_v40 = vld [vmem:[%s928_s3 + $0x38] sm:$0xff] }
  0x1e   : > { %603 = vmatprep.mubr.msk.bf16.mxu0 %vm319_vm2, %v647_v7  ;;  %611 = vmatprep.mubr.msk.bf16.mxu1 %vm319_vm2, %v648_v8  ;;  %v256_v12 = vld [vmem:[%s928_s3 + $0x50] sm:$0xff]  ;;  %v257_v20 = vld [vmem:[%s928_s3 + $0x58] sm:$0xff]  ;;  %v258_v39 = vld [vmem:[%s928_s3 + $0x60] sm:$0xff] }
  0x1f   : > { %v260_v36 = vld [vmem:[%s928_s3 + $0x70] sm:$0xff]  ;;  %v261_v44 = vld [vmem:[%s928_s3 + $0x78] sm:$0xff]  ;;  %v251_v45 = vld [vmem:[%s928_s3 + $0x28] sm:$0xff] }
  0x20   : > { %v259_v50 = vld [vmem:[%s928_s3 + $0x68] sm:$0xff] }
  0x25   : > { %604 = vmatmul.mubr.msk.bf16.gmra.mrb[4].mxu0 %vm319_vm2, %v649_v9  ;;  %612 = vmatmul.mubr.msk.bf16.gmra.mrb[4].mxu1 %vm319_vm2, %v650_v10 }
  0xf0   : > { %v601_v14 = vpop.f32.mrb[0].mxu0  ;;  %v609_v18 = vpop.f32.mrb[0].mxu1 }
  0xf1   : > { %v447_v17 = vadd.f32 %v601_v14, %v248_v11  ;;  %v382_v19 = vpop.f32.mrb[1].mxu0  ;;  %v455_v22 = vadd.f32 %v609_v18, %v256_v12  ;;  %v414_v24 = vpop.f32.mrb[1].mxu1 }
  0xf2   : > { %v445_v23 = vadd.f32 %v382_v19, %v246_v13  ;;  %v602_v25 = vpop.f32.mrb[2].mxu0  ;;  %v453_v27 = vadd.f32 %v414_v24, %v254_v15  ;;  %v610_v29 = vpop.f32.mrb[2].mxu1 }
  0xf3   : > { %464 = vst.msk [vmem:[%s928_s3 + $0x10] sm:$0xff] %vm461_vm3, %v447_v17  ;;  %v448_v28 = vadd.f32 %v602_v25, %v249_v16  ;;  %v385_v30 = vpop.f32.mrb[3].mxu0  ;;  %472 = vst.msk [vmem:[%s928_s3 + $0x50] sm:$0xff] %vm461_vm3, %v455_v22  ;;  %v456_v31 = vadd.f32 %v610_v29, %v257_v20  ;;  %v417_v33 = vpop.f32.mrb[3].mxu1 }
  0xf4   : > { %462 = vst.msk [vmem:[%s928_s3] sm:$0xff] %vm461_vm3, %v445_v23  ;;  %v446_v32 = vadd.f32 %v385_v30, %v247_v21  ;;  %470 = vst.msk [vmem:[%s928_s3 + $0x40] sm:$0xff] %vm461_vm3, %v453_v27  ;;  %v454_v34 = vadd.f32 %v417_v33, %v255_v26 }
  0xf5   : > { %465 = vst.msk [vmem:[%s928_s3 + $0x18] sm:$0xff] %vm461_vm3, %v448_v28  ;;  %473 = vst.msk [vmem:[%s928_s3 + $0x58] sm:$0xff] %vm461_vm3, %v456_v31 }
  0xf6   : > { %463 = vst.msk [vmem:[%s928_s3 + $0x8] sm:$0xff] %vm461_vm3, %v446_v32  ;;  %471 = vst.msk [vmem:[%s928_s3 + $0x48] sm:$0xff] %vm461_vm3, %v454_v34 }
  0xf8   : > { %v605_v38 = vpop.f32.mrb[4].mxu0  ;;  %v613_v42 = vpop.f32.mrb[4].mxu1 }
  0xf9   : > { %v451_v41 = vadd.f32 %v605_v38, %v252_v35  ;;  %v398_v43 = vpop.f32.mrb[5].mxu0  ;;  %v459_v46 = vadd.f32 %v613_v42, %v260_v36  ;;  %v430_v48 = vpop.f32.mrb[5].mxu1 }
  0xfa   : > { %v449_v47 = vadd.f32 %v398_v43, %v250_v37  ;;  %v606_v49 = vpop.f32.mrb[6].mxu0  ;;  %v457_v51 = vadd.f32 %v430_v48, %v258_v39  ;;  %v614_v53 = vpop.f32.mrb[6].mxu1 }
  0xfb   : > { %468 = vst.msk [vmem:[%s928_s3 + $0x30] sm:$0xff] %vm461_vm3, %v451_v41  ;;  %v452_v52 = vadd.f32 %v606_v49, %v253_v40  ;;  %v401_v54 = vpop.f32.mrb[7].mxu0  ;;  %476 = vst.msk [vmem:[%s928_s3 + $0x70] sm:$0xff] %vm461_vm3, %v459_v46  ;;  %v460_v55 = vadd.f32 %v614_v53, %v261_v44  ;;  %v433_v57 = vpop.f32.mrb[7].mxu1 }
  0xfc   : > { %466 = vst.msk [vmem:[%s928_s3 + $0x20] sm:$0xff] %vm461_vm3, %v449_v47  ;;  %v450_v56 = vadd.f32 %v401_v54, %v251_v45  ;;  %474 = vst.msk [vmem:[%s928_s3 + $0x60] sm:$0xff] %vm461_vm3, %v457_v51  ;;  %v458_v58 = vadd.f32 %v433_v57, %v259_v50 }
  0xfd   : > { %469 = vst.msk [vmem:[%s928_s3 + $0x38] sm:$0xff] %vm461_vm3, %v452_v52  ;;  %477 = vst.msk [vmem:[%s928_s3 + $0x78] sm:$0xff] %vm461_vm3, %v460_v55 }
  0xfe   : > { %467 = vst.msk [vmem:[%s928_s3 + $0x28] sm:$0xff] %vm461_vm3, %v450_v56  ;;  %475 = vst.msk [vmem:[%s928_s3 + $0x68] sm:$0xff] %vm461_vm3, %v458_v58 }
  0xff PF: > { %s13_s14 = sadd.s32 1, %s673_s14   ;;  %s929_s12 = smov %s669_s13 }
 0x100   : > { %p10_p6 = scmp.ge.s32.totalorder %s13_s14, 6   ;;  %s930_s13 = smov %s932_s15 }
 0x102   :  { %12 = sbr.rel (!%p10_p6) target bundleno = 2 (0x2), region = 69 }

</bundles_post_ra>
